<compile_context>
chip_gen: v7x
topology: tpu7x:2x2x1
jax: 0.10.0
libtpu: 0.0.40
codegen_flags: <defaults>
</compile_context>

<pallas_src>
import functools

import jax
import jax.numpy as jnp
import numpy as np
from jax.experimental import pallas as pl
from jax.experimental.pallas import tpu as pltpu

EPS = 1e-5


# --------------------------------------------------------------------------- #
# Fused kernel: conv1(1x1)+bn1+relu -> conv2(3x3)+bn2+relu -> conv3(1x1)+bn3
#               -> residual add -> relu, all resident in VMEM.
# --------------------------------------------------------------------------- #
def _bottleneck_kernel(x_ref, w1_ref, b1_ref, w2_ref, b2_ref, w3_ref, b3_ref,
                       o_ref, t1p_ref, *, H, W, Wp, Npad, dilation):
    # x_ref : (1, H*W, Cin)   f32 (NHWC flattened) -- also the residual
    # w1_ref: (Cin, Cw)       bf16 (BN1 scale folded in)
    # w2_ref: (9*Cw, Cw)      bf16 (im2col weight, BN2 scale folded in)
    # w3_ref: (Cw, Cout)      bf16 (BN3 scale folded in)
    # b*_ref: (1, C)          f32
    # o_ref : (1, H*W, Cout)
    # t1p_ref: VMEM (Npad, Cw) f32, flat zero-padded conv2 input:
    #          scratch row r*Wp + c  <->  padded pixel (r, c)
    d = dilation
    Cw = w1_ref.shape[-1]
    HWp = H * Wp
    top = d * Wp                      # rows of top halo band   (mult of 8)
    bot = Npad - top - HWp            # rows of bottom halo band (mult of 8)

    # ---- conv1 (1x1) + bn1 + relu : one big MXU matmul ----------------------
    xb = x_ref[0].astype(jnp.bfloat16)                              # (H*W, Cin)
    t1 = jnp.dot(xb, w1_ref[...], preferred_element_type=jnp.float32)
    t1 = jnp.maximum(t1 + b1_ref[...], 0.0)                         # (H*W, Cw)

    # ---- build flat zero-padded conv2 input in VMEM -------------------------
    # Left/right halo columns are baked into the single contiguous interior
    # store; only the small top/bottom bands need explicit zeroing.
    t1w = t1.reshape(H, W, Cw)
    zl = jnp.zeros((H, d, Cw), jnp.float32)
    zr = jnp.zeros((H, Wp - W - d, Cw), jnp.float32)
    mid = jnp.concatenate([zl, t1w, zr], axis=1).reshape(HWp, Cw)
    t1p_ref[pl.ds(0, top), :] = jnp.zeros((top, Cw), jnp.float32)
    t1p_ref[pl.ds(top, HWp), :] = mid
    t1p_ref[pl.ds(top + HWp, bot), :] = jnp.zeros((bot, Cw), jnp.float32)

    # ---- conv2 (3x3) + bn2 + relu : ONE im2col matmul (K = 9*Cw) ------------
    # Each tap is a contiguous shifted slice of the flat padded slab; output
    # row m = i*Wp + j (columns j >= W are junk and dropped below).
    taps = []
    for kh in range(3):
        for kw in range(3):
            off = kh * d * Wp + kw * d
            taps.append(t1p_ref[pl.ds(off, HWp), :].astype(jnp.bfloat16))
    col = jnp.concatenate(taps, axis=-1)                            # (H*Wp, 9*Cw)
    t2 = jnp.dot(col, w2_ref[...], preferred_element_type=jnp.float32)
    t2 = jnp.maximum(t2 + b2_ref[...], 0.0).astype(jnp.bfloat16)    # (H*Wp, Cw)
    # Drop junk halo columns once (single relayout, done in bf16).
    t2 = t2.reshape(H, Wp, Cw)[:, :W, :].reshape(H * W, Cw)

    # ---- conv3 (1x1) + bn3 + residual + relu --------------------------------
    y = jnp.dot(t2, w3_ref[...], preferred_element_type=jnp.float32)
    y = y + b3_ref[...] + x_ref[0]                                  # residual in f32
    o_ref[0] = jnp.maximum(y, 0.0).astype(o_ref.dtype)


# --------------------------------------------------------------------------- #
# Wrapper
# --------------------------------------------------------------------------- #
def fold_bn(gamma, beta, mean, var, eps=EPS):
    scale = gamma / jnp.sqrt(var + eps)
    bias = beta - mean * scale
    return scale, bias


def _round_up(n, m):
    return -(-n // m) * m


def bottleneck_forward(x_nchw, w1, bn1, w2_hwio, bn2, w3, bn3, *,
                       stride=1, dilation=1, groups=1):
    """Bottleneck forward (caffe_style=False => conv1 stride 1, conv2 stride)."""
    if stride != 1:
        # TODO(synk): stride > 1 (and the matching downsample residual path)
        # is not implemented in the fused kernel.
        raise NotImplementedError("stride != 1 not supported")
    if groups != 1:
        # TODO(synk): grouped 3x3 convolution not implemented.
        raise NotImplementedError("groups != 1 not supported")

    B, Cin, H, W = x_nchw.shape
    Cw = w1.shape[1]
    Cout = w3.shape[1]
    if Cin != Cout:
        raise ValueError("downsample=None requires in_channels == channels*4")

    d = dilation
    Wp = _round_up(W + 2 * d, 8)               # padded row width (sublane aligned)
    Hp = H + 2 * d
    Npad = _round_up(Hp * Wp + 2 * d, 8)       # flat padded-slab rows

    # Fold BN scale into the conv weights (kernel only adds bias + ReLU),
    # and cast matmul operands to bf16 for the MXU.  Note: the folded
    # gamma/sqrt(var+eps) is quantized to bf16 (accumulation stays f32).
    s1, b1 = fold_bn(*bn1)
    s2, b2 = fold_bn(*bn2)
    s3, b3 = fold_bn(*bn3)
    w1e = (w1 * s1[None, :]).astype(jnp.bfloat16)                    # (Cin, Cw)
    w2e = (w2_hwio * s2[None, None, None, :]).reshape(9 * Cw, Cw)    # (9*Cw, Cw)
    w2e = w2e.astype(jnp.bfloat16)
    w3e = (w3 * s3[None, :]).astype(jnp.bfloat16)                    # (Cw, Cout)
    b1e = b1.reshape(1, Cw).astype(jnp.float32)
    b2e = b2.reshape(1, Cw).astype(jnp.float32)
    b3e = b3.reshape(1, Cout).astype(jnp.float32)

    # NCHW -> NHWC flattened to (B, H*W, C).  The f32 input doubles as the
    # residual inside the kernel.  (In a full network, keep activations NHWC
    # across layers and drop these boundary transposes.)
    x = jnp.transpose(x_nchw, (0, 2, 3, 1)).reshape(B, H * W, Cin)
    x = x.astype(jnp.float32)

    # Explicit per-step VMEM budget (double-buffered blocks + scratch + temps).
    f32b, bf16b = 4, 2
    est = (2 * H * W * Cin * f32b                       # x block
           + 2 * H * W * Cout * f32b                    # out block
           + 2 * (Cin * Cw + 9 * Cw * Cw + Cw * Cout) * bf16b   # weights
           + 2 * (2 * Cw + Cout) * f32b                 # biases
           + Npad * Cw * f32b                           # flat padded scratch
           + H * Wp * 9 * Cw * bf16b                    # im2col slab
           + 3 * H * Wp * Cw * f32b                     # conv1/conv2 temps
           + H * W * (Cin + Cout) * f32b)               # misc temps
    vmem_limit = int(min(64 * 2**20, max(32 * 2**20, 2 * est)))

    kernel = functools.partial(_bottleneck_kernel, H=H, W=W, Wp=Wp, Npad=Npad,
                               dilation=d)

    out = pl.pallas_call(
        kernel,
        out_shape=jax.ShapeDtypeStruct((B, H * W, Cout), x_nchw.dtype),
        grid=(B,),
        in_specs=[
            pl.BlockSpec((1, H * W, Cin), lambda b: (b, 0, 0)),   # x / residual
            pl.BlockSpec((Cin, Cw), lambda b: (0, 0)),            # w1
            pl.BlockSpec((1, Cw), lambda b: (0, 0)),              # b1
            pl.BlockSpec((9 * Cw, Cw), lambda b: (0, 0)),         # w2 (im2col)
            pl.BlockSpec((1, Cw), lambda b: (0, 0)),              # b2
            pl.BlockSpec((Cw, Cout), lambda b: (0, 0)),           # w3
            pl.BlockSpec((1, Cout), lambda b: (0, 0)),            # b3
        ],
        out_specs=pl.BlockSpec((1, H * W, Cout), lambda b: (b, 0, 0)),
        scratch_shapes=[
            pltpu.VMEM((Npad, Cw), jnp.float32),   # flat padded conv2 input
        ],
        compiler_params=pltpu.CompilerParams(
            dimension_semantics=("parallel",),
            vmem_limit_bytes=vmem_limit),
    )(x, w1e, b1e, w2e, b2e, w3e, b3e)

    return jnp.transpose(out.reshape(B, H, W, Cout), (0, 3, 1, 2))   # -> NCHW


# --------------------------------------------------------------------------- #
# Pure-JAX reference (for correctness check)
# --------------------------------------------------------------------------- #
def reference_bottleneck(x_nchw, w1, bn1, w2_hwio, bn2, w3, bn3, *,
                         stride=1, dilation=1):
    def bn(y, p):
        gamma, beta, mean, var = p
        s = gamma / jnp.sqrt(var + EPS)
        b = beta - mean * s
        return y * s[None, :, None, None] + b[None, :, None, None]

    def conv(y, w_hwio, st=1, dil=1, padding=0):
        return jax.lax.conv_general_dilated(
            y, w_hwio, (st, st),
            ((padding, padding), (padding, padding)),
            rhs_dilation=(dil, dil),
            dimension_numbers=("NCHW", "HWIO", "NCHW"),
            precision=jax.lax.Precision.HIGHEST)

    identity = x_nchw
    out = jax.nn.relu(bn(conv(x_nchw, w1[None, None]), bn1))
    out = jax.nn.relu(bn(conv(out, w2_hwio, st=stride, dil=dilation,
                              padding=dilation), bn2))
    out = bn(conv(out, w3[None, None]), bn3)
    return jax.nn.relu(out + identity)


# --------------------------------------------------------------------------- #
# Main
# --------------------------------------------------------------------------- #
if __name__ == "__main__":
    B, H, W = 2, 16, 16
    channels = 4
    in_channels = channels * 4          # 16 (so the residual add is valid)
    groups, base_width, dilation, stride = 1, 64, 1, 1
    width = int(channels * (base_width / 64.0)) * groups   # 4
    out_channels = channels * 4                            # 16

    key = jax.random.PRNGKey(0)
    keys = jax.random.split(key, 8)

    x_nchw = jax.random.normal(keys[0], (B, in_channels, H, W), jnp.float32)

    # conv weights (stored directly in kernel-friendly layouts)
    w1 = 0.1 * jax.random.normal(keys[1], (in_channels, width), jnp.float32)     # 1x1: (Cin, Cout)
    w2 = 0.1 * jax.random.normal(keys[2], (3, 3, width, width), jnp.float32)     # 3x3: HWIO
    w3 = 0.1 * jax.random.normal(keys[3], (width, out_channels), jnp.float32)    # 1x1: (Cin, Cout)

    def bn_params(k, c):
        k1, k2, k3, k4 = jax.random.split(k, 4)
        gamma = 1.0 + 0.1 * jax.random.normal(k1, (c,), jnp.float32)
        beta = 0.1 * jax.random.normal(k2, (c,), jnp.float32)
        mean = 0.1 * jax.random.normal(k3, (c,), jnp.float32)
        var = 1.0 + 0.1 * jax.random.uniform(k4, (c,), jnp.float32)
        return gamma, beta, mean, var

    bn1 = bn_params(keys[4], width)
    bn2 = bn_params(keys[5], width)
    bn3 = bn_params(keys[6], out_channels)

    out = bottleneck_forward(x_nchw, w1, bn1, w2, bn2, w3, bn3,
                             stride=stride, dilation=dilation, groups=groups)
    out = jax.block_until_ready(out)

    ref = jax.block_until_ready(
        reference_bottleneck(x_nchw, w1, bn1, w2, bn2, w3, bn3,
                             stride=stride, dilation=dilation))

    np.testing.assert_allclose(np.asarray(out), np.asarray(ref),
                               rtol=3e-2, atol=3e-2)
    print("KERNEL_OK")
</pallas_src>

<mosaic_0001>
module attributes {stable_mosaic.version = 11 : i64} {
  func.func @_bottleneck_kernel(%arg0: i32, %arg1: memref<1x256x16xf32, #tpu.memory_space<vmem>>, %arg2: memref<16x4xbf16, #tpu.memory_space<vmem>>, %arg3: memref<1x4xf32, #tpu.memory_space<vmem>>, %arg4: memref<36x4xbf16, #tpu.memory_space<vmem>>, %arg5: memref<1x4xf32, #tpu.memory_space<vmem>>, %arg6: memref<4x16xbf16, #tpu.memory_space<vmem>>, %arg7: memref<1x16xf32, #tpu.memory_space<vmem>>, %arg8: memref<1x256x16xf32, #tpu.memory_space<vmem>>, %arg9: memref<440x4xf32, #tpu.memory_space<vmem>>) attributes {dimension_semantics = [#tpu.dimension_semantics<parallel>], iteration_bounds = array<i64: 2>, scalar_prefetch = 0 : i64, scratch_operands = 1 : i64, tpu.core_type = #tpu.core_type<tc>, window_params = [{transform_indices = @transform_0, window_bounds = array<i64: 1, 256, 16>}, {pipeline_mode = #tpu.pipeline_mode<synchronous>, transform_indices = @transform_1, window_bounds = array<i64: 16, 4>}, {pipeline_mode = #tpu.pipeline_mode<synchronous>, transform_indices = @transform_2, window_bounds = array<i64: 1, 4>}, {pipeline_mode = #tpu.pipeline_mode<synchronous>, transform_indices = @transform_3, window_bounds = array<i64: 36, 4>}, {pipeline_mode = #tpu.pipeline_mode<synchronous>, transform_indices = @transform_4, window_bounds = array<i64: 1, 4>}, {pipeline_mode = #tpu.pipeline_mode<synchronous>, transform_indices = @transform_5, window_bounds = array<i64: 4, 16>}, {pipeline_mode = #tpu.pipeline_mode<synchronous>, transform_indices = @transform_6, window_bounds = array<i64: 1, 16>}, {transform_indices = @transform_7, window_bounds = array<i64: 1, 256, 16>}]} {
    %c0 = arith.constant 0 : index
    %c0_0 = arith.constant 0 : index
    %c0_1 = arith.constant 0 : index
    %0 = vector.load %arg1[%c0, %c0_0, %c0_1] : memref<1x256x16xf32, #tpu.memory_space<vmem>>, vector<1x256x16xf32>
    %1 = vector.shape_cast %0 : vector<1x256x16xf32> to vector<256x16xf32>
    %2 = arith.truncf %1 : vector<256x16xf32> to vector<256x16xbf16>
    %c0_2 = arith.constant 0 : index
    %c0_3 = arith.constant 0 : index
    %3 = vector.load %arg2[%c0_2, %c0_3] : memref<16x4xbf16, #tpu.memory_space<vmem>>, vector<16x4xbf16>
    %cst = arith.constant dense<0.000000e+00> : vector<256x4xf32>
    %4 = tpu.matmul %2, %3, %cst {dimension_numbers = #tpu.dot_dimension_numbers<[1], [0], [0], [1], [0, 0, 1, 1], [], []>} : vector<256x16xbf16>, vector<16x4xbf16>, vector<256x4xf32> -> vector<256x4xf32>
    %c0_4 = arith.constant 0 : index
    %c0_5 = arith.constant 0 : index
    %5 = vector.load %arg3[%c0_4, %c0_5] : memref<1x4xf32, #tpu.memory_space<vmem>>, vector<1x4xf32>
    %6 = vector.broadcast %5 : vector<1x4xf32> to vector<256x4xf32>
    %7 = arith.addf %4, %6 : vector<256x4xf32>
    %cst_6 = arith.constant 0.000000e+00 : f32
    %8 = vector.broadcast %cst_6 : f32 to vector<256x4xf32>
    %9 = arith.maximumf %7, %8 : vector<256x4xf32>
    %10 = vector.shape_cast %9 : vector<256x4xf32> to vector<16x16x4xf32>
    %cst_7 = arith.constant 0.000000e+00 : f32
    %11 = vector.broadcast %cst_7 : f32 to vector<16x1x4xf32>
    %cst_8 = arith.constant 0.000000e+00 : f32
    %12 = vector.broadcast %cst_8 : f32 to vector<16x7x4xf32>
    %13 = tpu.concatenate %11, %10, %12 in 1 : vector<16x1x4xf32>, vector<16x16x4xf32>, vector<16x7x4xf32> -> vector<16x24x4xf32>
    %14 = vector.shape_cast %13 : vector<16x24x4xf32> to vector<384x4xf32>
    %cst_9 = arith.constant 0.000000e+00 : f32
    %15 = vector.broadcast %cst_9 : f32 to vector<24x4xf32>
    %c0_10 = arith.constant 0 : index
    %c0_11 = arith.constant 0 : index
    %16 = vector.load %arg9[%c0_10, %c0_11] : memref<440x4xf32, #tpu.memory_space<vmem>>, vector<24x4xf32>
    tpu.vector_store %arg9[%c0_10, %c0_11], %15 {strides = array<i32>} : memref<440x4xf32, #tpu.memory_space<vmem>>, vector<24x4xf32>,
    %c24 = arith.constant 24 : index
    %c0_12 = arith.constant 0 : index
    %17 = vector.load %arg9[%c24, %c0_12] : memref<440x4xf32, #tpu.memory_space<vmem>>, vector<384x4xf32>
    tpu.vector_store %arg9[%c24, %c0_12], %14 {strides = array<i32>} : memref<440x4xf32, #tpu.memory_space<vmem>>, vector<384x4xf32>,
    %cst_13 = arith.constant 0.000000e+00 : f32
    %18 = vector.broadcast %cst_13 : f32 to vector<32x4xf32>
    %c408 = arith.constant 408 : index
    %c0_14 = arith.constant 0 : index
    %19 = vector.load %arg9[%c408, %c0_14] : memref<440x4xf32, #tpu.memory_space<vmem>>, vector<32x4xf32>
    tpu.vector_store %arg9[%c408, %c0_14], %18 {strides = array<i32>} : memref<440x4xf32, #tpu.memory_space<vmem>>, vector<32x4xf32>,
    %c0_15 = arith.constant 0 : index
    %c0_16 = arith.constant 0 : index
    %20 = vector.load %arg9[%c0_15, %c0_16] : memref<440x4xf32, #tpu.memory_space<vmem>>, vector<384x4xf32>
    %21 = arith.truncf %20 : vector<384x4xf32> to vector<384x4xbf16>
    %c1 = arith.constant 1 : index
    %c0_17 = arith.constant 0 : index
    %22 = vector.load %arg9[%c1, %c0_17] : memref<440x4xf32, #tpu.memory_space<vmem>>, vector<384x4xf32>
    %23 = arith.truncf %22 : vector<384x4xf32> to vector<384x4xbf16>
    %c2 = arith.constant 2 : index
    %c0_18 = arith.constant 0 : index
    %24 = vector.load %arg9[%c2, %c0_18] : memref<440x4xf32, #tpu.memory_space<vmem>>, vector<384x4xf32>
    %25 = arith.truncf %24 : vector<384x4xf32> to vector<384x4xbf16>
    %c24_19 = arith.constant 24 : index
    %c0_20 = arith.constant 0 : index
    %26 = vector.load %arg9[%c24_19, %c0_20] : memref<440x4xf32, #tpu.memory_space<vmem>>, vector<384x4xf32>
    %27 = arith.truncf %26 : vector<384x4xf32> to vector<384x4xbf16>
    %c25 = arith.constant 25 : index
    %c0_21 = arith.constant 0 : index
    %28 = vector.load %arg9[%c25, %c0_21] : memref<440x4xf32, #tpu.memory_space<vmem>>, vector<384x4xf32>
    %29 = arith.truncf %28 : vector<384x4xf32> to vector<384x4xbf16>
    %c26 = arith.constant 26 : index
    %c0_22 = arith.constant 0 : index
    %30 = vector.load %arg9[%c26, %c0_22] : memref<440x4xf32, #tpu.memory_space<vmem>>, vector<384x4xf32>
    %31 = arith.truncf %30 : vector<384x4xf32> to vector<384x4xbf16>
    %c48 = arith.constant 48 : index
    %c0_23 = arith.constant 0 : index
    %32 = vector.load %arg9[%c48, %c0_23] : memref<440x4xf32, #tpu.memory_space<vmem>>, vector<384x4xf32>
    %33 = arith.truncf %32 : vector<384x4xf32> to vector<384x4xbf16>
    %c49 = arith.constant 49 : index
    %c0_24 = arith.constant 0 : index
    %34 = vector.load %arg9[%c49, %c0_24] : memref<440x4xf32, #tpu.memory_space<vmem>>, vector<384x4xf32>
    %35 = arith.truncf %34 : vector<384x4xf32> to vector<384x4xbf16>
    %c50 = arith.constant 50 : index
    %c0_25 = arith.constant 0 : index
    %36 = vector.load %arg9[%c50, %c0_25] : memref<440x4xf32, #tpu.memory_space<vmem>>, vector<384x4xf32>
    %37 = arith.truncf %36 : vector<384x4xf32> to vector<384x4xbf16>
    %38 = tpu.concatenate %21, %23, %25, %27, %29, %31, %33, %35, %37 in 1 : vector<384x4xbf16>, vector<384x4xbf16>, vector<384x4xbf16>, vector<384x4xbf16>, vector<384x4xbf16>, vector<384x4xbf16>, vector<384x4xbf16>, vector<384x4xbf16>, vector<384x4xbf16> -> vector<384x36xbf16>
    %c0_26 = arith.constant 0 : index
    %c0_27 = arith.constant 0 : index
    %39 = vector.load %arg4[%c0_26, %c0_27] : memref<36x4xbf16, #tpu.memory_space<vmem>>, vector<36x4xbf16>
    %cst_28 = arith.constant dense<0.000000e+00> : vector<384x4xf32>
    %40 = tpu.matmul %38, %39, %cst_28 {dimension_numbers = #tpu.dot_dimension_numbers<[1], [0], [0], [1], [0, 0, 1, 1], [], []>} : vector<384x36xbf16>, vector<36x4xbf16>, vector<384x4xf32> -> vector<384x4xf32>
    %c0_29 = arith.constant 0 : index
    %c0_30 = arith.constant 0 : index
    %41 = vector.load %arg5[%c0_29, %c0_30] : memref<1x4xf32, #tpu.memory_space<vmem>>, vector<1x4xf32>
    %42 = vector.broadcast %41 : vector<1x4xf32> to vector<384x4xf32>
    %43 = arith.addf %40, %42 : vector<384x4xf32>
    %cst_31 = arith.constant 0.000000e+00 : f32
    %44 = vector.broadcast %cst_31 : f32 to vector<384x4xf32>
    %45 = arith.maximumf %43, %44 : vector<384x4xf32>
    %46 = arith.truncf %45 : vector<384x4xf32> to vector<384x4xbf16>
    %47 = vector.shape_cast %46 : vector<384x4xbf16> to vector<16x24x4xbf16>
    %48 = vector.extract_strided_slice %47 {offsets = [0, 0, 0], sizes = [16, 16, 4], strides = [1, 1, 1]} : vector<16x24x4xbf16> to vector<16x16x4xbf16>
    %49 = vector.shape_cast %48 : vector<16x16x4xbf16> to vector<256x4xbf16>
    %c0_32 = arith.constant 0 : index
    %c0_33 = arith.constant 0 : index
    %50 = vector.load %arg6[%c0_32, %c0_33] : memref<4x16xbf16, #tpu.memory_space<vmem>>, vector<4x16xbf16>
    %cst_34 = arith.constant dense<0.000000e+00> : vector<256x16xf32>
    %51 = tpu.matmul %49, %50, %cst_34 {dimension_numbers = #tpu.dot_dimension_numbers<[1], [0], [0], [1], [0, 0, 1, 1], [], []>} : vector<256x4xbf16>, vector<4x16xbf16>, vector<256x16xf32> -> vector<256x16xf32>
    %c0_35 = arith.constant 0 : index
    %c0_36 = arith.constant 0 : index
    %52 = vector.load %arg7[%c0_35, %c0_36] : memref<1x16xf32, #tpu.memory_space<vmem>>, vector<1x16xf32>
    %53 = vector.broadcast %52 : vector<1x16xf32> to vector<256x16xf32>
    %54 = arith.addf %51, %53 : vector<256x16xf32>
    %c0_37 = arith.constant 0 : index
    %c0_38 = arith.constant 0 : index
    %c0_39 = arith.constant 0 : index
    %55 = vector.load %arg1[%c0_37, %c0_38, %c0_39] : memref<1x256x16xf32, #tpu.memory_space<vmem>>, vector<1x256x16xf32>
    %56 = vector.shape_cast %55 : vector<1x256x16xf32> to vector<256x16xf32>
    %57 = arith.addf %54, %56 : vector<256x16xf32>
    %cst_40 = arith.constant 0.000000e+00 : f32
    %58 = vector.broadcast %cst_40 : f32 to vector<256x16xf32>
    %59 = arith.maximumf %57, %58 : vector<256x16xf32>
    %c0_41 = arith.constant 0 : index
    %c0_42 = arith.constant 0 : index
    %c0_43 = arith.constant 0 : index
    %60 = vector.load %arg8[%c0_41, %c0_42, %c0_43] : memref<1x256x16xf32, #tpu.memory_space<vmem>>, vector<1x256x16xf32>
    %61 = vector.shape_cast %60 : vector<1x256x16xf32> to vector<256x16xf32>
    %62 = vector.shape_cast %59 : vector<256x16xf32> to vector<1x256x16xf32>
    tpu.vector_store %arg8[%c0_41, %c0_42, %c0_43], %62 {strides = array<i32>} : memref<1x256x16xf32, #tpu.memory_space<vmem>>, vector<1x256x16xf32>,
    return
  }
  func.func @transform_0(%arg0: i32) -> (i32, i32, i32) {
    %c0_i32 = arith.constant 0 : i32
    %c0_i32_0 = arith.constant 0 : i32
    %c0_i32_1 = arith.constant 0 : i32
    return %arg0, %c0_i32, %c0_i32_0 : i32, i32, i32
  }
  func.func @transform_1(%arg0: i32) -> (i32, i32) {
    %c0_i32 = arith.constant 0 : i32
    %c0_i32_0 = arith.constant 0 : i32
    %c0_i32_1 = arith.constant 0 : i32
    return %c0_i32, %c0_i32_0 : i32, i32
  }
  func.func @transform_2(%arg0: i32) -> (i32, i32) {
    %c0_i32 = arith.constant 0 : i32
    %c0_i32_0 = arith.constant 0 : i32
    %c0_i32_1 = arith.constant 0 : i32
    return %c0_i32, %c0_i32_0 : i32, i32
  }
  func.func @transform_3(%arg0: i32) -> (i32, i32) {
    %c0_i32 = arith.constant 0 : i32
    %c0_i32_0 = arith.constant 0 : i32
    %c0_i32_1 = arith.constant 0 : i32
    return %c0_i32, %c0_i32_0 : i32, i32
  }
  func.func @transform_4(%arg0: i32) -> (i32, i32) {
    %c0_i32 = arith.constant 0 : i32
    %c0_i32_0 = arith.constant 0 : i32
    %c0_i32_1 = arith.constant 0 : i32
    return %c0_i32, %c0_i32_0 : i32, i32
  }
  func.func @transform_5(%arg0: i32) -> (i32, i32) {
    %c0_i32 = arith.constant 0 : i32
    %c0_i32_0 = arith.constant 0 : i32
    %c0_i32_1 = arith.constant 0 : i32
    return %c0_i32, %c0_i32_0 : i32, i32
  }
  func.func @transform_6(%arg0: i32) -> (i32, i32) {
    %c0_i32 = arith.constant 0 : i32
    %c0_i32_0 = arith.constant 0 : i32
    %c0_i32_1 = arith.constant 0 : i32
    return %c0_i32, %c0_i32_0 : i32, i32
  }
  func.func @transform_7(%arg0: i32) -> (i32, i32, i32) {
    %c0_i32 = arith.constant 0 : i32
    %c0_i32_0 = arith.constant 0 : i32
    %c0_i32_1 = arith.constant 0 : i32
    return %arg0, %c0_i32, %c0_i32_0 : i32, i32, i32
  }
}

</mosaic_0001>

<bundles_post_ra>
// kernel: tpu_custom_call.1
= control target key start
LH: loop header
LB: loop body
LE: loop exit
PB: predicated region body
PF: predicated region fallthrough
CT: control target
= control target key end

     0   :  { %s3262_s24 = smov 0   ;;  %s4578_s0 = inlined_call_operand.vmem [shape: f32[2,256,16], index: 0, kind: input, shape index: {}]   ;;  %s4579_s1 = inlined_call_operand.vmem [shape: bf16[16,4], index: 1, kind: input, shape index: {}]   ;;  %s4580_s2 = inlined_call_operand.vmem [shape: f32[1,4], index: 2, kind: input, shape index: {}]   ;;  %s4581_s3 = inlined_call_operand.vmem [shape: bf16[36,4], index: 3, kind: input, shape index: {}]   ;;  %s4582_s4 = inlined_call_operand.vmem [shape: f32[1,4], index: 4, kind: input, shape index: {}]   ;;  %s4583_s5 = inlined_call_operand.vmem [shape: bf16[4,16], index: 5, kind: input, shape index: {}]   ;;  %s4584_s6 = inlined_call_operand.vmem [shape: f32[1,16], index: 6, kind: input, shape index: {}]   ;;  %s4585_s7 = inlined_call_operand.vmem [shape: f32[2,256,16], index: 7, kind: output, shape index: {}]  }
   0x1 LB: > { %s2917_s25 = sadd.s32 4294967295, %s3211_s24   ;;  %p2921_p0 = scmp.ge.s32.totalorder %s3211_s24, 1  ;;  %s3211_s24 = sphi %s3262_s24, %s17_s24  }
   0x2   : > { %p237_p1 = scmp.lt.s32.totalorder %s3211_s24, 3 }
   0x4   : > { %p238_p2 = pnand %p2921_p0, %p237_p1 }
   0x5   : > { %v3197_v0 = vld [vmem:[%s4579_s1] sm:$0xff] (!%p238_p2)   ;;  %p269_p3 = scmp.lt.s32.totalorder (!%p238_p2), %s2917_s25, 1  ;;  %vm343_vm0 = vcmask (!%p238_p2), 130048   ;;  %vm746_vm1 = vcmask (!%p238_p2), 31744   ;;  %v3213_v49 = vmov (!%p238_p2), 0.0   ;;  %s3214_s9 = smov (!%p238_p2), 8  }
   0x6   : > { %241 = sbr.rel (%p238_p2) target bundleno = 1192 (0x4a8), region = 48  ;;  %3054 = vmatprep.subr.bf16.mxu0 (!%p238_p2), %v3197_v0  ;;  %3176 = vmatprep.subr.bf16.mxu1 (!%p238_p2), %v3197_v0  ;;  %747 = vst.msk [vmem:[#allocation2] sm:$0xff] (!%p238_p2), %vm746_vm1, %v3213_v49  ;;  %748 = vst.msk [vmem:[#allocation2 + $0x8] sm:$0xff] (!%p238_p2), %vm746_vm1, %v3213_v49  ;;  %s3215_s10 = smov (!%p238_p2), 4   ;;  %v3343_v56 = vld [vmem:[%s4580_s2] ss:$0 sm:$0xff] (!%p238_p2) }
   0x7   : > { %3055 = vmatpush3.bf16.msra.mxu0 (!%p238_p2), %v3197_v0  ;;  %3177 = vmatpush3.bf16.msra.mxu1 (!%p238_p2), %v3197_v0  ;;  %749 = vst.msk [vmem:[#allocation2 + $0x10] sm:$0xff] (!%p238_p2), %vm746_vm1, %v3213_v49  ;;  %798 = vst.msk [vmem:[#allocation2 + $0x198] sm:$0xff] (!%p238_p2), %vm746_vm1, %v3213_v49  ;;  %vm617_vm2 = vcmask (!%p238_p2), 1040384   ;;  %s3216_s13 = smov (!%p238_p2), 24   ;;  %s3217_s14 = smov (!%p238_p2), 28   ;;  %vm2141_vm3 = vcmask (!%p238_p2), 1041408  }
   0x8   : > { %799 = vst.msk [vmem:[#allocation2 + $0x1a0] sm:$0xff] (!%p238_p2), %vm746_vm1, %v3213_v49  ;;  %800 = vst.msk [vmem:[#allocation2 + $0x1a8] sm:$0xff] (!%p238_p2), %vm746_vm1, %v3213_v49  ;;  %s3218_s15 = smov (!%p238_p2), 32   ;;  %s3219_s16 = smov (!%p238_p2), 12   ;;  %vm1723_vm4 = vcmask (!%p238_p2), 64512   ;;  %vm1772_vm5 = vcmask (!%p238_p2), 97280  }
   0x9   : > { %801 = vst.msk [vmem:[#allocation2 + $0x1b0] sm:$0xff] (!%p238_p2), %vm746_vm1, %v3213_v49  ;;  %s3220_s17 = smov (!%p238_p2), 16   ;;  %s3221_s18 = smov (!%p238_p2), 20   ;;  %vm1918_vm6 = vcmask (!%p238_p2), 195584   ;;  %vm1869_vm7 = vcmask (!%p238_p2), 162816   ;;  %vm1967_vm8 = vcmask (!%p238_p2), 228352  }
   0xa   : > { %vm2016_vm9 = vcmask (!%p238_p2), 261120   ;;  %vm2092_vm10 = vcmask (!%p238_p2), 293888  }
   0xd   : > { %s4587_s25 = smov (!%p269_p3, %s2917_s25), 1  ;;  %v946_v50 = vld [vmem:[#allocation2 + $0x2] sm:$0xff] }
   0xe   : > { %s2991_s28 = sshll.u32 %s4587_s25, 8  ;;  %v947_v51 = vld [vmem:[#allocation2 + $0xa] sm:$0xff]  ;;  %v874_v52 = vld [vmem:[#allocation2 + $0x1] sm:$0xff] }
   0xf   : > { %s3281_s8 = scalar_lea.vmem %s4578_s0, %s2991_s28  ;;  %v994_v53 = vpack.c.bf16 %v947_v51, %v946_v50  ;;  %v875_v54 = vld [vmem:[#allocation2 + $0x9] sm:$0xff] }
  0x10   : > { %v280_v1 = vld [vmem:[%s3281_s8] sm:$0xff]  ;;  %v281_v2 = vld [vmem:[%s3281_s8 + $0x8] sm:$0xff]  ;;  %v282_v3 = vld [vmem:[%s3281_s8 + $0x10] sm:$0xff]  ;;  %v922_v55 = vpack.c.bf16 %v875_v54, %v874_v52 }
  0x11   : > { %v312_v4 = vpack.c.bf16 %v281_v2, %v280_v1  ;;  %v283_v5 = vld [vmem:[%s3281_s8 + $0x18] sm:$0xff]  ;;  %v284_v6 = vld [vmem:[%s3281_s8 + $0x20] sm:$0xff]  ;;  %v285_v7 = vld [vmem:[%s3281_s8 + $0x28] sm:$0xff]  ;;  %1213 = vrot.lane.b32.xlu1 %v994_v53, %s3214_s9 }
  0x12   : > { %v313_v8 = vpack.c.bf16 %v283_v5, %v282_v3  ;;  %v314_v9 = vpack.c.bf16 %v285_v7, %v284_v6  ;;  %v304_v10 = vld [vmem:[%s3281_s8 + $0xc0] sm:$0xff]  ;;  %v305_v11 = vld [vmem:[%s3281_s8 + $0xc8] sm:$0xff]  ;;  %v306_v12 = vld [vmem:[%s3281_s8 + $0xd0] sm:$0xff]  ;;  %1141 = vrot.lane.b32.xlu0 %v922_v55, %s3215_s10 }
  0x13   : > { %3056 = vmatprep.mubr.msk.bf16.mxu0 %vm343_vm0, %v312_v4  ;;  %v286_v13 = vld [vmem:[%s3281_s8 + $0x30] sm:$0xff]  ;;  %v287_v14 = vld [vmem:[%s3281_s8 + $0x38] sm:$0xff]  ;;  %v324_v15 = vpack.c.bf16 %v305_v11, %v304_v10  ;;  %v288_v17 = vld [vmem:[%s3281_s8 + $0x40] sm:$0xff] }
  0x14   : > { %3057 = vmatmul.mubr.msk.bf16.vlgmr.msra.gmra.mrb[0].mxu0 %vm343_vm0, %v313_v8  ;;  %v307_v16 = vld [vmem:[%s3281_s8 + $0xd8] sm:$0xff]  ;;  %v289_v18 = vld [vmem:[%s3281_s8 + $0x48] sm:$0xff]  ;;  %v308_v20 = vld [vmem:[%s3281_s8 + $0xe0] sm:$0xff]  ;;  %v315_v22 = vpack.c.bf16 %v287_v14, %v286_v13 }
  0x15   : > { %3060 = vmatprep.mubr.msk.bf16.mxu0 %vm343_vm0, %v314_v9  ;;  %v325_v19 = vpack.c.bf16 %v307_v16, %v306_v12  ;;  %3080 = vmatprep.mubr.msk.bf16.mxu1 %vm343_vm0, %v324_v15  ;;  %v309_v21 = vld [vmem:[%s3281_s8 + $0xe8] sm:$0xff]  ;;  %v316_v24 = vpack.c.bf16 %v289_v18, %v288_v17  ;;  %v310_v25 = vld [vmem:[%s3281_s8 + $0xf0] sm:$0xff]  ;;  %v311_v26 = vld [vmem:[%s3281_s8 + $0xf8] sm:$0xff] }
  0x16   : > { %v326_v23 = vpack.c.bf16 %v309_v21, %v308_v20  ;;  %v327_v27 = vpack.c.bf16 %v311_v26, %v310_v25  ;;  %v290_v28 = vld [vmem:[%s3281_s8 + $0x50] sm:$0xff]  ;;  %v291_v29 = vld [vmem:[%s3281_s8 + $0x58] sm:$0xff]  ;;  %v292_v30 = vld [vmem:[%s3281_s8 + $0x60] sm:$0xff] }
  0x17   : > { %3081 = vmatmul.mubr.msk.bf16.vlgmr.msra.gmra.mrb[0].mxu1 %vm343_vm0, %v325_v19  ;;  %v293_v31 = vld [vmem:[%s3281_s8 + $0x68] sm:$0xff]  ;;  %v317_v32 = vpack.c.bf16 %v291_v29, %v290_v28  ;;  %v294_v34 = vld [vmem:[%s3281_s8 + $0x70] sm:$0xff]  ;;  %v295_v35 = vld [vmem:[%s3281_s8 + $0x78] sm:$0xff] }
  0x18   : > { %3084 = vmatprep.mubr.msk.bf16.mxu1 %vm343_vm0, %v326_v23  ;;  %v318_v33 = vpack.c.bf16 %v293_v31, %v292_v30  ;;  %v296_v36 = vld [vmem:[%s3281_s8 + $0x80] sm:$0xff]  ;;  %v297_v37 = vld [vmem:[%s3281_s8 + $0x88] sm:$0xff]  ;;  %v319_v38 = vpack.c.bf16 %v295_v35, %v294_v34  ;;  %v298_v40 = vld [vmem:[%s3281_s8 + $0x90] sm:$0xff] }
  0x19   : > { %v320_v39 = vpack.c.bf16 %v297_v37, %v296_v36  ;;  %v299_v41 = vld [vmem:[%s3281_s8 + $0x98] sm:$0xff]  ;;  %v300_v42 = vld [vmem:[%s3281_s8 + $0xa0] sm:$0xff]  ;;  %v301_v43 = vld [vmem:[%s3281_s8 + $0xa8] sm:$0xff] }
  0x1a   : > { %v321_v44 = vpack.c.bf16 %v299_v41, %v298_v40  ;;  %v322_v45 = vpack.c.bf16 %v301_v43, %v300_v42  ;;  %v302_v46 = vld [vmem:[%s3281_s8 + $0xb0] sm:$0xff]  ;;  %v303_v47 = vld [vmem:[%s3281_s8 + $0xb8] sm:$0xff] }
  0x1b   : > { %v323_v48 = vpack.c.bf16 %v303_v47, %v302_v46 }
  0x1c   : > { %3061 = vmatmul.mubr.msk.bf16.gmra.mrb[4].mxu0 %vm343_vm0, %v315_v22 }
  0x1d   : > { %3064 = vmatprep.mubr.msk.bf16.mxu0 %vm343_vm0, %v316_v24 }
  0x1f   : > { %3085 = vmatmul.mubr.msk.bf16.gmra.mrb[4].mxu1 %vm343_vm0, %v327_v27 }
  0x24   : > { %3065 = vmatmul.mubr.msk.bf16.gmra.mrb[8].mxu0 %vm343_vm0, %v317_v32 }
  0x25   : > { %3068 = vmatprep.mubr.msk.bf16.mxu0 %vm343_vm0, %v318_v33 }
  0x2c   : > { %3069 = vmatmul.mubr.msk.bf16.gmra.mrb[12].mxu0 %vm343_vm0, %v319_v38 }
  0x2d   : > { %3072 = vmatprep.mubr.msk.bf16.mxu0 %vm343_vm0, %v320_v39 }
  0x34   : > { %3073 = vmatmul.mubr.msk.bf16.gmra.mrb[16].mxu0 %vm343_vm0, %v321_v44 }
  0x35   : > { %3076 = vmatprep.mubr.msk.bf16.mxu0 %vm343_vm0, %v322_v45 }
  0x3c   : > { %3077 = vmatmul.mubr.msk.bf16.gmra.mrb[20].mxu0 %vm343_vm0, %v323_v48 }
  0xe7   : > { %v3058_v57 = vpop.f32.mrb[0].mxu0 }
  0xe8   : > { %v435_v58 = vadd.f32 %v3058_v57, %v3343_v56  ;;  %v426_v59 = vpop.f32.mrb[1].mxu0 }
  0xe9   : > { %v427_v60 = vadd.f32 %v3343_v56, %v426_v59  ;;  %v3059_v61 = vpop.f32.mrb[2].mxu0 }
  0xea   : > { %v555_v62 = vmax.f32 %v435_v58, 0.0  ;;  %v438_v63 = vadd.f32 %v3059_v61, %v3343_v56  ;;  %v429_v0 = vpop.f32.mrb[3].mxu0  ;;  %v3082_v3 = vpop.f32.mrb[0].mxu1 }
  0xeb   : > { %v553_v1 = vmax.f32 %v427_v60, 0.0  ;;  %v430_v2 = vadd.f32 %v3343_v56, %v429_v0  ;;  %v531_v6 = vadd.f32 %v3082_v3, %v3343_v56  ;;  %v522_v7 = vpop.f32.mrb[1].mxu1 }
  0xec   : > { %v621_v4 = vrot.slane %v555_v62, 7  ;;  %v556_v5 = vmax.f32 %v438_v63, 0.0  ;;  %v523_v10 = vadd.f32 %v3343_v56, %v522_v7  ;;  %v3083_v11 = vpop.f32.mrb[2].mxu1 }
  0xed   : > { %v618_v8 = vrot.slane %v553_v1, 7  ;;  %v554_v9 = vmax.f32 %v430_v2, 0.0  ;;  %v579_v14 = vmax.f32 %v531_v6, 0.0  ;;  %v534_v15 = vadd.f32 %v3083_v11, %v3343_v56  ;;  %v525_v16 = vpop.f32.mrb[3].mxu1 }
  0xee   : > { %v715_v12 = vsel %vm617_vm2, 0.0, %v621_v4  ;;  %v622_v13 = vrot.slane %v556_v5, 7  ;;  %v577_v20 = vmax.f32 %v523_v10, 0.0  ;;  %v526_v21 = vadd.f32 %v3343_v56, %v525_v16 }
  0xef   : > { %753 = vst.msk [vmem:[#allocation2 + $0x30] sm:$0xff] %vm746_vm1, %v715_v12  ;;  %v714_v17 = vsel %vm617_vm2, 0.0, %v618_v8  ;;  %v619_v18 = vrot.slane %v554_v9, 7  ;;  %v3062_v19 = vpop.f32.mrb[4].mxu0  ;;  %v657_v26 = vrot.slane %v579_v14, 7  ;;  %v580_v36 = vmax.f32 %v534_v15, 0.0 }
  0xf0   : > { %750 = vst.msk [vmem:[#allocation2 + $0x18] sm:$0xff] %vm746_vm1, %v714_v17  ;;  %v623_v22 = vsel %vm617_vm2, %v621_v4, %v622_v13  ;;  %v731_v23 = vsel %vm617_vm2, %v622_v13, 0.0  ;;  %v451_v24 = vadd.f32 %v3062_v19, %v3343_v56  ;;  %v442_v25 = vpop.f32.mrb[5].mxu0  ;;  %v654_v31 = vrot.slane %v577_v20, 7 }
  0xf1   : > { %754 = vst.msk [vmem:[#allocation2 + $0x38] sm:$0xff] %vm746_vm1, %v623_v22  ;;  %755 = vst.msk [vmem:[#allocation2 + $0x40] sm:$0xff] %vm746_vm1, %v731_v23  ;;  %v620_v27 = vsel %vm617_vm2, %v618_v8, %v619_v18  ;;  %v730_v28 = vsel %vm617_vm2, %v619_v18, 0.0  ;;  %v443_v29 = vadd.f32 %v3343_v56, %v442_v25  ;;  %v3063_v30 = vpop.f32.mrb[6].mxu0  ;;  %v727_v35 = vsel %vm617_vm2, 0.0, %v657_v26 }
  0xf2   : > { %751 = vst.msk [vmem:[#allocation2 + $0x20] sm:$0xff] %vm746_vm1, %v620_v27  ;;  %752 = vst.msk [vmem:[#allocation2 + $0x28] sm:$0xff] %vm746_vm1, %v730_v28  ;;  %v559_v32 = vmax.f32 %v451_v24, 0.0  ;;  %v454_v33 = vadd.f32 %v3063_v30, %v3343_v56  ;;  %v445_v34 = vpop.f32.mrb[7].mxu0  ;;  %v726_v39 = vsel %vm617_vm2, 0.0, %v654_v31  ;;  %v578_v40 = vmax.f32 %v526_v21, 0.0 }
  0xf3   : > { %v557_v37 = vmax.f32 %v443_v29, 0.0  ;;  %v446_v38 = vadd.f32 %v3343_v56, %v445_v34  ;;  %789 = vst.msk [vmem:[#allocation2 + $0x150] sm:$0xff] %vm746_vm1, %v727_v35  ;;  %v3086_v41 = vpop.f32.mrb[4].mxu1  ;;  %786 = vst.msk [vmem:[#allocation2 + $0x138] sm:$0xff] %vm746_vm1, %v726_v39  ;;  %v658_v44 = vrot.slane %v580_v36, 7 }
  0xf4   : > { %v627_v42 = vrot.slane %v559_v32, 7  ;;  %v560_v43 = vmax.f32 %v454_v33, 0.0  ;;  %v547_v45 = vadd.f32 %v3086_v41, %v3343_v56  ;;  %v538_v46 = vpop.f32.mrb[5].mxu1  ;;  %v655_v49 = vrot.slane %v578_v40, 7 }
  0xf5   : > { %v624_v47 = vrot.slane %v557_v37, 7  ;;  %v558_v48 = vmax.f32 %v446_v38, 0.0  ;;  %v539_v50 = vadd.f32 %v3343_v56, %v538_v46  ;;  %v3087_v51 = vpop.f32.mrb[6].mxu1  ;;  %v659_v54 = vsel %vm617_vm2, %v657_v26, %v658_v44 }
  0xf6   : > { %v717_v52 = vsel %vm617_vm2, 0.0, %v627_v42  ;;  %v628_v53 = vrot.slane %v560_v43, 7  ;;  %v743_v55 = vsel %vm617_vm2, %v658_v44, 0.0  ;;  %v541_v57 = vpop.f32.mrb[7].mxu1  ;;  %v3380_v60 = vld [vmem:[#allocation2 + $0x30] sm:$0xff]  ;;  %790 = vst.msk [vmem:[#allocation2 + $0x158] sm:$0xff] %vm746_vm1, %v659_v54  ;;  %v656_v61 = vsel %vm617_vm2, %v654_v31, %v655_v49 }
  0xf7   : > { %759 = vst.msk [vmem:[#allocation2 + $0x60] sm:$0xff] %vm746_vm1, %v717_v52  ;;  %v716_v58 = vsel %vm617_vm2, 0.0, %v624_v47  ;;  %v625_v59 = vrot.slane %v558_v48, 7  ;;  %791 = vst.msk [vmem:[#allocation2 + $0x160] sm:$0xff] %vm746_vm1, %v743_v55  ;;  %v742_v62 = vsel %vm617_vm2, %v655_v49, 0.0  ;;  %v3066_v63 = vpop.f32.mrb[8].mxu0  ;;  %v550_v16 = vadd.f32 %v3087_v51, %v3343_v56 }
  0xf8   : > { %756 = vst.msk [vmem:[#allocation2 + $0x48] sm:$0xff] %vm746_vm1, %v716_v58  ;;  %v629_v0 = vsel %vm617_vm2, %v627_v42, %v628_v53  ;;  %v733_v1 = vsel %vm617_vm2, %v628_v53, 0.0  ;;  %v3389_v2 = vld [vmem:[#allocation2 + $0x31] sm:$0xff]  ;;  %v3391_v3 = vld [vmem:[#allocation2 + $0x39] sm:$0xff]  ;;  %787 = vst.msk [vmem:[#allocation2 + $0x140] sm:$0xff] %vm746_vm1, %v656_v61  ;;  %v583_v5 = vmax.f32 %v547_v45, 0.0  ;;  %v542_v19 = vadd.f32 %v3343_v56, %v541_v57 }
  0xf9   : > { %v3393_v4 = vld [vmem:[#allocation2 + $0x38] sm:$0xff]  ;;  %788 = vst.msk [vmem:[#allocation2 + $0x148] sm:$0xff] %vm746_vm1, %v742_v62  ;;  %v581_v6 = vmax.f32 %v539_v50, 0.0  ;;  %760 = vst.msk [vmem:[#allocation2 + $0x68] sm:$0xff] %vm746_vm1, %v629_v0  ;;  %v626_v7 = vsel %vm617_vm2, %v624_v47, %v625_v59  ;;  %v732_v8 = vsel %vm617_vm2, %v625_v59, 0.0  ;;  %v925_v9 = vpack.c.bf16 %v3391_v3, %v3389_v2  ;;  %v458_v13 = vpop.f32.mrb[9].mxu0 }
  0xfa   : > { %761 = vst.msk [vmem:[#allocation2 + $0x70] sm:$0xff] %vm746_vm1, %v733_v1  ;;  %v3405_v10 = vpack.c.bf16 %v3393_v4, %v3380_v60  ;;  %v3407_v11 = vld [vmem:[#allocation2 + $0x32] sm:$0xff]  ;;  %v3409_v12 = vld [vmem:[#allocation2 + $0x3a] sm:$0xff]  ;;  %757 = vst.msk [vmem:[#allocation2 + $0x50] sm:$0xff] %vm746_vm1, %v626_v7  ;;  %v663_v14 = vrot.slane %v583_v5, 7  ;;  %v3067_v17 = vpop.f32.mrb[10].mxu0  ;;  %v467_v20 = vadd.f32 %v3066_v63, %v3343_v56  ;;  %v459_v26 = vadd.f32 %v3343_v56, %v458_v13 }
  0xfb   : > { %758 = vst.msk [vmem:[#allocation2 + $0x58] sm:$0xff] %vm746_vm1, %v732_v8  ;;  %v660_v15 = vrot.slane %v581_v6, 7  ;;  %1147 = vrot.lane.b32.xlu1 %v925_v9, %s3215_s10  ;;  %v997_v18 = vpack.c.bf16 %v3409_v12, %v3407_v11  ;;  %v3421_v21 = vld [vmem:[#allocation2 + $0x1a] sm:$0xff]  ;;  %v461_v22 = vpop.f32.mrb[11].mxu0  ;;  %v584_v25 = vmax.f32 %v550_v16, 0.0  ;;  %v582_v27 = vmax.f32 %v542_v19, 0.0 }
  0xfc   : > { %1501 = vrot.lane.b32.xlu0 %v3405_v10, %s3216_s13  ;;  %v729_v23 = vsel %vm617_vm2, 0.0, %v663_v14  ;;  %v563_v28 = vmax.f32 %v467_v20, 0.0  ;;  %v948_v29 = vld [vmem:[#allocation2 + $0x12] sm:$0xff]  ;;  %v470_v30 = vadd.f32 %v3067_v17, %v3343_v56  ;;  %v462_v31 = vadd.f32 %v3343_v56, %v461_v22  ;;  %v3445_v52 = vld [vmem:[#allocation2 + $0x40] sm:$0xff]  ;;  %v3447_v54 = vld [vmem:[#allocation2 + $0x28] sm:$0xff] }
  0xfd   : > { %v728_v24 = vsel %vm617_vm2, 0.0, %v660_v15  ;;  %795 = vst.msk [vmem:[#allocation2 + $0x180] sm:$0xff] %vm746_vm1, %v729_v23  ;;  %v664_v32 = vrot.slane %v584_v25, 7  ;;  %v995_v33 = vpack.c.bf16 %v3421_v21, %v948_v29  ;;  %v561_v34 = vmax.f32 %v459_v26, 0.0  ;;  %v3461_v6 = vld [vmem:[#allocation2 + $0x20] sm:$0xff] }
  0xfe   : > { %792 = vst.msk [vmem:[#allocation2 + $0x168] sm:$0xff] %vm746_vm1, %v728_v24  ;;  %v661_v35 = vrot.slane %v582_v27, 7  ;;  %v633_v36 = vrot.slane %v563_v28, 7  ;;  %v564_v37 = vmax.f32 %v470_v30, 0.0  ;;  %v562_v38 = vmax.f32 %v462_v31, 0.0 }
  0xff   : > { %1219 = vrot.lane.b32.xlu1 %v997_v18, %s3214_s9  ;;  %v3070_v39 = vpop.f32.mrb[12].mxu0  ;;  %v665_v40 = vsel %vm617_vm2, %v663_v14, %v664_v32  ;;  %v745_v41 = vsel %vm617_vm2, %v664_v32, 0.0  ;;  %v630_v42 = vrot.slane %v561_v34, 7  ;;  %v1023_v7 = vpack.c.bf16 %v3445_v52, %v3393_v4  ;;  %v3469_v14 = vld [vmem:[#allocation2 + $0x29] sm:$0xff] }
 0x100   : > { %1552 = vrot.lane.b32.xlu0 %v925_v9, %s3217_s14  ;;  %v483_v43 = vadd.f32 %v3070_v39, %v3343_v56  ;;  %v474_v44 = vpop.f32.mrb[13].mxu0  ;;  %796 = vst.msk [vmem:[#allocation2 + $0x188] sm:$0xff] %vm746_vm1, %v665_v40  ;;  %797 = vst.msk [vmem:[#allocation2 + $0x190] sm:$0xff] %vm746_vm1, %v745_v41  ;;  %v662_v45 = vsel %vm617_vm2, %v660_v15, %v661_v35  ;;  %v744_v46 = vsel %vm617_vm2, %v661_v35, 0.0  ;;  %v719_v47 = vsel %vm617_vm2, 0.0, %v633_v36  ;;  %v3471_v15 = vld [vmem:[#allocation2 + $0x19] sm:$0xff] }
 0x101   : > { %v634_v48 = vrot.slane %v564_v37, 7  ;;  %v3071_v49 = vpop.f32.mrb[14].mxu0  ;;  %793 = vst.msk [vmem:[#allocation2 + $0x170] sm:$0xff] %vm746_vm1, %v662_v45  ;;  %794 = vst.msk [vmem:[#allocation2 + $0x178] sm:$0xff] %vm746_vm1, %v744_v46  ;;  %v718_v50 = vsel %vm617_vm2, 0.0, %v630_v42  ;;  %v631_v51 = vrot.slane %v562_v38, 7  ;;  %v475_v55 = vadd.f32 %v3343_v56, %v474_v44 }
 0x102   : > { %765 = vst.msk [vmem:[#allocation2 + $0x90] sm:$0xff] %vm746_vm1, %v719_v47  ;;  %v567_v53 = vmax.f32 %v483_v43, 0.0  ;;  %v477_v57 = vpop.f32.mrb[15].mxu0  ;;  %762 = vst.msk [vmem:[#allocation2 + $0x78] sm:$0xff] %vm746_vm1, %v718_v50  ;;  %v486_v61 = vadd.f32 %v3071_v49, %v3343_v56  ;;  %v1022_v8 = vpack.c.bf16 %v3380_v60, %v3447_v54  ;;  %v876_v60 = vld [vmem:[#allocation2 + $0x11] sm:$0xff]  ;;  %v852_v20 = vpack.c.bf16 %v3447_v54, %v3461_v6  ;;  %v878_v41 = vld [vmem:[#allocation2 + $0x21] sm:$0xff] }
 0x103   : > { %1215 = vrot.lane.b32.xlu1 %v995_v33, %s3214_s9  ;;  %v635_v58 = vsel %vm617_vm2, %v633_v36, %v634_v48  ;;  %v735_v59 = vsel %vm617_vm2, %v634_v48, 0.0  ;;  %v478_v62 = vadd.f32 %v3343_v56, %v477_v57  ;;  %v632_v63 = vsel %vm617_vm2, %v630_v42, %v631_v51  ;;  %v3495_v35 = vld [vmem:[#allocation2 + $0x2a] sm:$0xff]  ;;  %v3500_v40 = vld [vmem:[#allocation2 + $0x18] sm:$0xff] }
 0x104   : > { %1603 = vrot.lane.b32.xlu0 %v997_v18, %s3218_s15  ;;  %766 = vst.msk [vmem:[#allocation2 + $0x98] sm:$0xff] %vm746_vm1, %v635_v58  ;;  %767 = vst.msk [vmem:[#allocation2 + $0xa0] sm:$0xff] %vm746_vm1, %v735_v59  ;;  %v734_v0 = vsel %vm617_vm2, %v631_v51, 0.0  ;;  %v639_v1 = vrot.slane %v567_v53, 7  ;;  %v565_v5 = vmax.f32 %v475_v55, 0.0  ;;  %v568_v9 = vmax.f32 %v486_v61, 0.0 }
 0x105   : > { %763 = vst.msk [vmem:[#allocation2 + $0x80] sm:$0xff] %vm746_vm1, %v632_v63  ;;  %764 = vst.msk [vmem:[#allocation2 + $0x88] sm:$0xff] %vm746_vm1, %v734_v0  ;;  %v566_v13 = vmax.f32 %v478_v62, 0.0  ;;  %v1049_v24 = vpack.c.bf16 %v3389_v2, %v3469_v14  ;;  %v923_v25 = vpack.c.bf16 %v3471_v15, %v876_v60  ;;  %v1076_v43 = vpack.c.bf16 %v3407_v11, %v3495_v35  ;;  %v915_v60 = vld [vmem:[#allocation2 + $0x149] sm:$0xff] }
 0x106   : > { %v721_v16 = vsel %vm617_vm2, 0.0, %v639_v1  ;;  %v636_v17 = vrot.slane %v565_v5, 7  ;;  %v640_v4 = vrot.slane %v568_v9, 7  ;;  %v1021_v44 = vpack.c.bf16 %v3461_v6, %v3500_v40  ;;  %v842_v5 = vld [vmem:[#allocation2 + $0x140] sm:$0xff] }
 0x107   : > { %771 = vst.msk [vmem:[#allocation2 + $0xc0] sm:$0xff] %vm746_vm1, %v721_v16  ;;  %1287 = vrot.lane.b32.xlu1 %v1022_v8, %s3219_s16  ;;  %v637_v18 = vrot.slane %v566_v13, 7  ;;  %v3074_v19 = vpop.f32.mrb[16].mxu0  ;;  %v924_v50 = vpack.c.bf16 %v3469_v14, %v878_v41  ;;  %v1048_v63 = vpack.c.bf16 %v878_v41, %v3471_v15  ;;  %v950_v8 = vld [vmem:[#allocation2 + $0x22] sm:$0xff] }
 0x108   : > { %1289 = vrot.lane.b32.xlu0 %v1023_v7, %s3219_s16  ;;  %v720_v22 = vsel %vm617_vm2, 0.0, %v636_v17  ;;  %v499_v23 = vadd.f32 %v3074_v19, %v3343_v56  ;;  %v490_v26 = vpop.f32.mrb[17].mxu0  ;;  %v641_v27 = vsel %vm617_vm2, %v639_v1, %v640_v4  ;;  %v737_v28 = vsel %vm617_vm2, %v640_v4, 0.0  ;;  %v843_v7 = vld [vmem:[#allocation2 + $0x148] sm:$0xff] }
 0x109   : > { %768 = vst.msk [vmem:[#allocation2 + $0xa8] sm:$0xff] %vm746_vm1, %v720_v22  ;;  %v638_v29 = vsel %vm617_vm2, %v636_v17, %v637_v18  ;;  %v736_v30 = vsel %vm617_vm2, %v637_v18, 0.0  ;;  %v3075_v31 = vpop.f32.mrb[18].mxu0  ;;  %772 = vst.msk [vmem:[#allocation2 + $0xc8] sm:$0xff] %vm746_vm1, %v641_v27  ;;  %v491_v32 = vadd.f32 %v3343_v56, %v490_v26  ;;  %v3527_v17 = vpack.c.bf16 %v843_v7, %v842_v5  ;;  %v914_v19 = vld [vmem:[#allocation2 + $0x141] sm:$0xff] }
 0x10a   : > { %773 = vst.msk [vmem:[#allocation2 + $0xd0] sm:$0xff] %vm746_vm1, %v737_v28  ;;  %769 = vst.msk [vmem:[#allocation2 + $0xb0] sm:$0xff] %vm746_vm1, %v638_v29  ;;  %v571_v2 = vmax.f32 %v499_v23, 0.0  ;;  %v502_v33 = vadd.f32 %v3075_v31, %v3343_v56  ;;  %v493_v34 = vpop.f32.mrb[19].mxu0  ;;  %v1075_v15 = vpack.c.bf16 %v950_v8, %v3421_v21  ;;  %v3544_v26 = vld [vmem:[#allocation2 + $0x48] sm:$0xff]  ;;  %v3198_v29 = vld [vmem:[%s4581_s3] sm:$0xff]  }
 0x10b   : > { %770 = vst.msk [vmem:[#allocation2 + $0xb8] sm:$0xff] %vm746_vm1, %v736_v30  ;;  %1359 = vrot.lane.b32.xlu1 %v1049_v24, %s3220_s17  ;;  %v494_v36 = vadd.f32 %v3343_v56, %v493_v34  ;;  %v569_v38 = vmax.f32 %v491_v32, 0.0  ;;  %v3541_v24 = vpack.c.bf16 %v915_v60, %v914_v19  ;;  %v882_v27 = vld [vmem:[#allocation2 + $0x41] sm:$0xff]  ;;  %v3554_v30 = vpack.c.bf16 %v3544_v26, %v3445_v52  ;;  %v820_v19 = vld [vmem:[#allocation2 + $0x90] sm:$0xff]  ;;  %v821_v60 = vld [vmem:[#allocation2 + $0x98] sm:$0xff] }
 0x10c   : > { %1143 = vrot.lane.b32.xlu0 %v923_v25, %s3215_s10  ;;  %v645_v37 = vrot.slane %v571_v2, 7  ;;  %v572_v39 = vmax.f32 %v502_v33, 0.0  ;;  %v996_v25 = vpack.c.bf16 %v3495_v35, %v950_v8  ;;  %v1050_v31 = vpack.c.bf16 %v882_v27, %v3391_v3  ;;  %3088 = vmatprep.subr.bf16.mxu1 %v3198_v29  ;;  %v3557_v2 = vld [vmem:[#allocation2 + $0x60] sm:$0xff]  ;;  %v815_v32 = vld [vmem:[#allocation2 + $0x68] sm:$0xff] }
 0x10d   : > { %v570_v42 = vmax.f32 %v494_v36, 0.0  ;;  %v642_v46 = vrot.slane %v569_v38, 7  ;;  %v954_v33 = vld [vmem:[#allocation2 + $0x42] sm:$0xff]  ;;  %3089 = vmatpush3.bf16.msra.mxu1 %v3198_v29  ;;  %v3566_v52 = vpack.c.bf16 %v815_v32, %v3557_v2 }
 0x10e   : > { %v723_v45 = vsel %vm617_vm2, 0.0, %v645_v37  ;;  %v646_v47 = vrot.slane %v572_v39, 7  ;;  %v3199_v34 = vld [vmem:[%s4581_s3 + $0x8] sm:$0xff]   ;;  %v1077_v3 = vpack.c.bf16 %v954_v33, %v3409_v12  ;;  %v3200_v12 = vld [vmem:[%s4581_s3 + $0x10] ss:$0 sps:$4 sm:$0x33]  }
 0x10f   : > { %777 = vst.msk [vmem:[#allocation2 + $0xf0] sm:$0xff] %vm746_vm1, %v723_v45  ;;  %v643_v48 = vrot.slane %v570_v42, 7  ;;  %v3078_v49 = vpop.f32.mrb[20].mxu0  ;;  %1431 = vrot.lane.b32.xlu1 %v1076_v43, %s3221_s18  ;;  %v722_v11 = vsel %vm617_vm2, 0.0, %v642_v46  ;;  %v886_v35 = vld [vmem:[#allocation2 + $0x61] sm:$0xff]  ;;  %3090 = vmatprep.subr.bf16.mxu1 %v3199_v34  ;;  %v3572_v39 = vld [vmem:[#allocation2 + $0x6a] sm:$0xff] }
 0x110   : > { %1285 = vrot.lane.b32.xlu0 %v1021_v44, %s3219_s16  ;;  %v647_v51 = vsel %vm617_vm2, %v645_v37, %v646_v47  ;;  %v739_v53 = vsel %vm617_vm2, %v646_v47, 0.0  ;;  %v515_v55 = vadd.f32 %v3078_v49, %v3343_v56  ;;  %v506_v57 = vpop.f32.mrb[21].mxu0  ;;  %774 = vst.msk [vmem:[#allocation2 + $0xd8] sm:$0xff] %vm746_vm1, %v722_v11  ;;  %v3570_v37 = vld [vmem:[#allocation2 + $0x69] sm:$0xff]  ;;  %v2143_v44 = vsel %vm2141_vm3, %v3200_v12, 0 }
 0x111   : > { %778 = vst.msk [vmem:[#allocation2 + $0xf8] sm:$0xff] %vm746_vm1, %v647_v51  ;;  %779 = vst.msk [vmem:[#allocation2 + $0x100] sm:$0xff] %vm746_vm1, %v739_v53  ;;  %v644_v58 = vsel %vm617_vm2, %v642_v46, %v643_v48  ;;  %v738_v59 = vsel %vm617_vm2, %v643_v48, 0.0  ;;  %v507_v61 = vadd.f32 %v3343_v56, %v506_v57  ;;  %v3079_v62 = vpop.f32.mrb[22].mxu0  ;;  %v958_v38 = vld [vmem:[#allocation2 + $0x62] sm:$0xff]  ;;  %3091 = vmatpush3.bf16.msra.mxu1 %v3199_v34  ;;  %v816_v45 = vld [vmem:[#allocation2 + $0x70] sm:$0xff] }
 0x112   : > { %775 = vst.msk [vmem:[#allocation2 + $0xe0] sm:$0xff] %vm746_vm1, %v644_v58  ;;  %776 = vst.msk [vmem:[#allocation2 + $0xe8] sm:$0xff] %vm746_vm1, %v738_v59  ;;  %v575_v0 = vmax.f32 %v515_v55, 0.0  ;;  %v518_v1 = vadd.f32 %v3079_v62, %v3343_v56  ;;  %v509_v28 = vpop.f32.mrb[23].mxu0  ;;  %v1000_v42 = vpack.c.bf16 %v3572_v39, %v958_v38  ;;  %3178 = vmatprep.subr.msk.bf16.mxu1 %vm2141_vm3, %v3200_v12  ;;  %v955_v49 = vld [vmem:[#allocation2 + $0x4a] sm:$0xff]  ;;  %v813_v53 = vld [vmem:[#allocation2 + $0x58] sm:$0xff] }
 0x113   : > { %v573_v9 = vmax.f32 %v507_v61, 0.0  ;;  %1145 = vrot.lane.b32.xlu1 %v924_v50, %s3215_s10  ;;  %v510_v36 = vadd.f32 %v3343_v56, %v509_v28  ;;  %v928_v56 = vpack.c.bf16 %v3570_v37, %v886_v35  ;;  %v1026_v48 = vpack.c.bf16 %v816_v45, %v815_v32  ;;  %v883_v11 = vld [vmem:[#allocation2 + $0x49] sm:$0xff]  ;;  %v884_v58 = vld [vmem:[#allocation2 + $0x51] sm:$0xff]  ;;  %v885_v59 = vld [vmem:[#allocation2 + $0x59] sm:$0xff] }
 0x114   : > { %1357 = vrot.lane.b32.xlu0 %v1048_v63, %s3220_s17  ;;  %v651_v13 = vrot.slane %v575_v0, 7  ;;  %v576_v14 = vmax.f32 %v518_v1, 0.0  ;;  %v998_v50 = vpack.c.bf16 %v955_v49, %v954_v33  ;;  %v812_v51 = vld [vmem:[#allocation2 + $0x50] sm:$0xff]  ;;  %v926_v55 = vpack.c.bf16 %v883_v11, %v882_v27  ;;  %v957_v0 = vld [vmem:[#allocation2 + $0x5a] sm:$0xff]  ;;  %v962_v12 = vld [vmem:[#allocation2 + $0x82] sm:$0xff] }
 0x115   : > { %v648_v16 = vrot.slane %v573_v9, 7  ;;  %v574_v41 = vmax.f32 %v510_v36, 0.0  ;;  %3093 = vmatpush3.bf16.msra.mxu1 %v2143_v44  ;;  %v3594_v57 = vpack.c.bf16 %v813_v53, %v812_v51  ;;  %v1024_v61 = vpack.c.bf16 %v812_v51, %v3544_v26  ;;  %v956_v63 = vld [vmem:[#allocation2 + $0x52] sm:$0xff]  ;;  %v3628_v28 = vld [vmem:[#allocation2 + $0x9a] sm:$0xff] }
 0x116   : > { %v725_v4 = vsel %vm617_vm2, 0.0, %v651_v13  ;;  %v652_v18 = vrot.slane %v576_v14, 7  ;;  %v927_v62 = vpack.c.bf16 %v885_v59, %v884_v58  ;;  %v1051_v1 = vpack.c.bf16 %v884_v58, %v883_v11  ;;  %v888_v14 = vld [vmem:[#allocation2 + $0x71] sm:$0xff]  ;;  %v822_v32 = vld [vmem:[#allocation2 + $0xa0] sm:$0xff] }
 0x117   : > { %783 = vst.msk [vmem:[#allocation2 + $0x120] sm:$0xff] %vm746_vm1, %v725_v4  ;;  %v724_v22 = vsel %vm617_vm2, 0.0, %v648_v16  ;;  %1535 = vrot.lane.b32.xlu1 %v3527_v17, %s3216_s13  ;;  %v649_v43 = vrot.slane %v574_v41, 7  ;;  %v999_v5 = vpack.c.bf16 %v957_v0, %v956_v63  ;;  %v1078_v7 = vpack.c.bf16 %v956_v63, %v955_v49  ;;  %v964_v27 = vld [vmem:[#allocation2 + $0x92] sm:$0xff]  ;;  %v3668_v63 = vld [vmem:[#allocation2 + $0xa8] sm:$0xff] }
 0x118   : > { %1429 = vrot.lane.b32.xlu0 %v1075_v15, %s3221_s18  ;;  %780 = vst.msk [vmem:[#allocation2 + $0x108] sm:$0xff] %vm746_vm1, %v724_v22  ;;  %v653_v23 = vsel %vm617_vm2, %v651_v13, %v652_v18  ;;  %v741_v21 = vsel %vm617_vm2, %v652_v18, 0.0  ;;  %v1025_v8 = vpack.c.bf16 %v3557_v2, %v813_v53  ;;  %v1052_v9 = vpack.c.bf16 %v886_v35, %v885_v59  ;;  %v960_v18 = vld [vmem:[#allocation2 + $0x72] sm:$0xff]  ;;  %v819_v2 = vld [vmem:[#allocation2 + $0x88] sm:$0xff] }
 0x119   : > { %784 = vst.msk [vmem:[#allocation2 + $0x128] sm:$0xff] %vm746_vm1, %v653_v23  ;;  %785 = vst.msk [vmem:[#allocation2 + $0x130] sm:$0xff] %vm746_vm1, %v741_v21  ;;  %v650_v46 = vsel %vm617_vm2, %v648_v16, %v649_v43  ;;  %v740_v47 = vsel %vm617_vm2, %v649_v43, 0.0  ;;  %v1079_v13 = vpack.c.bf16 %v958_v38, %v957_v0  ;;  %v817_v16 = vld [vmem:[#allocation2 + $0x78] sm:$0xff]  ;;  %v1053_v15 = vpack.c.bf16 %v888_v14, %v3570_v37  ;;  %v891_v35 = vld [vmem:[#allocation2 + $0x89] sm:$0xff]  ;;  %v1142_v43 = vpop.permute.xlu0 %1141 }
 0x11a   : > { %781 = vst.msk [vmem:[#allocation2 + $0x110] sm:$0xff] %vm746_vm1, %v650_v46  ;;  %782 = vst.msk [vmem:[#allocation2 + $0x118] sm:$0xff] %vm746_vm1, %v740_v47  ;;  %v3614_v4 = vpack.c.bf16 %v817_v16, %v816_v45  ;;  %v1080_v22 = vpack.c.bf16 %v960_v18, %v3572_v39  ;;  %v3620_v23 = vpack.c.bf16 %v821_v60, %v820_v19  ;;  %v892_v21 = vld [vmem:[#allocation2 + $0x91] sm:$0xff]  ;;  %v889_v36 = vld [vmem:[#allocation2 + $0x79] sm:$0xff] }
 0x11b   : > { %1586 = vrot.lane.b32.xlu1 %v3541_v24, %s3217_s14  ;;  %v1003_v29 = vpack.c.bf16 %v3628_v28, %v964_v27  ;;  %v1029_v34 = vpack.c.bf16 %v822_v32, %v821_v60  ;;  %v929_v38 = vpack.c.bf16 %v889_v36, %v888_v14  ;;  %v961_v39 = vld [vmem:[#allocation2 + $0x7a] sm:$0xff]  ;;  %v1028_v47 = vpack.c.bf16 %v820_v19, %v819_v2 }
 0x11c   : > { %1217 = vrot.lane.b32.xlu0 %v996_v25, %s3214_s9  ;;  %v3622_v25 = vld [vmem:[#allocation2 + $0x99] sm:$0xff]  ;;  %v1001_v41 = vpack.c.bf16 %v961_v39, %v960_v18  ;;  %v1055_v11 = vpack.c.bf16 %v892_v21, %v891_v35  ;;  %v1081_v59 = vpack.c.bf16 %v962_v12, %v961_v39  ;;  %v3670_v0 = vld [vmem:[#allocation2 + $0xa1] sm:$0xff] }
 0x11d   : > { %v931_v26 = vpack.c.bf16 %v3622_v25, %v892_v21  ;;  %v3683_v14 = vld [vmem:[#allocation2 + $0xc0] sm:$0xff] }
 0x11f   : > { %1503 = vrot.lane.b32.xlu1 %v3554_v30, %s3216_s13 }
 0x120   : > { %1361 = vrot.lane.b32.xlu0 %v1050_v31, %s3220_s17  ;;  %v818_v31 = vld [vmem:[#allocation2 + $0x80] sm:$0xff] }
 0x121   : > { %v3635_v33 = vpack.c.bf16 %v819_v2, %v818_v31 }
 0x123   : > { %1507 = vrot.lane.b32.xlu1 %v3566_v52, %s3216_s13 }
 0x124   : > { %1433 = vrot.lane.b32.xlu0 %v1077_v3, %s3221_s18  ;;  %v890_v3 = vld [vmem:[#allocation2 + $0x81] sm:$0xff] }
 0x125   : > { %v930_v37 = vpack.c.bf16 %v891_v35, %v890_v3  ;;  %v1054_v51 = vpack.c.bf16 %v890_v3, %v889_v36  ;;  %v3712_v3 = vld [vmem:[#allocation2 + $0xd0] sm:$0xff] }
 0x127   : > { %1558 = vrot.lane.b32.xlu1 %v928_v56, %s3217_s14 }
 0x128   : > { %1609 = vrot.lane.b32.xlu0 %v1000_v42, %s3218_s15 }
 0x12b   : > { %1295 = vrot.lane.b32.xlu1 %v1026_v48, %s3219_s16  ;;  %v1027_v48 = vpack.c.bf16 %v818_v31, %v817_v16  ;;  %v827_v16 = vld [vmem:[#allocation2 + $0xc8] sm:$0xff] }
 0x12c   : > { %1225 = vrot.lane.b32.xlu0 %v1000_v42, %s3214_s9  ;;  %v1214_v42 = vpop.permute.xlu1 %1213 }
 0x12f   : > { %1153 = vrot.lane.b32.xlu1 %v928_v56, %s3215_s10  ;;  %v963_v56 = vld [vmem:[#allocation2 + $0x8a] sm:$0xff] }
 0x130   : > { %1605 = vrot.lane.b32.xlu0 %v998_v50, %s3218_s15  ;;  %v1002_v44 = vpack.c.bf16 %v963_v56, %v962_v12  ;;  %v1082_v58 = vpack.c.bf16 %v964_v27, %v963_v56  ;;  %v3698_v27 = vld [vmem:[#allocation2 + $0xc2] sm:$0xff]  ;;  %v967_v56 = vld [vmem:[#allocation2 + $0xaa] sm:$0xff] }
 0x133   : > { %1554 = vrot.lane.b32.xlu1 %v926_v55, %s3217_s14 }
 0x134   : > { %1505 = vrot.lane.b32.xlu0 %v3594_v57, %s3216_s13 }
 0x137   : > { %1291 = vrot.lane.b32.xlu1 %v1024_v61, %s3219_s16 }
 0x138   : > { %1556 = vrot.lane.b32.xlu0 %v927_v62, %s3217_s14 }
 0x13b   : > { %1363 = vrot.lane.b32.xlu1 %v1051_v1, %s3220_s17  ;;  %v803_v1 = vld [vmem:[#allocation2 + $0x8] sm:$0xff] }
 0x13c   : > { %1607 = vrot.lane.b32.xlu0 %v999_v5, %s3218_s15 }
 0x13f   : > { %1435 = vrot.lane.b32.xlu1 %v1078_v7, %s3221_s18 }
 0x140   : > { %1221 = vrot.lane.b32.xlu0 %v998_v50, %s3214_s9 }
 0x143   : > { %1149 = vrot.lane.b32.xlu1 %v926_v55, %s3215_s10 }
 0x144   : > { %1293 = vrot.lane.b32.xlu0 %v1025_v8, %s3219_s16 }
 0x147   : > { %1151 = vrot.lane.b32.xlu1 %v927_v62, %s3215_s10 }
 0x148   : > { %1365 = vrot.lane.b32.xlu0 %v1052_v9, %s3220_s17  ;;  %v3679_v9 = vpack.c.bf16 %v3668_v63, %v822_v32 }
 0x14b   : > { %1223 = vrot.lane.b32.xlu1 %v999_v5, %s3214_s9  ;;  %v802_v5 = vld [vmem:[#allocation2] sm:$0xff] }
 0x14c   : > { %1437 = vrot.lane.b32.xlu0 %v1079_v13, %s3221_s18  ;;  %v1056_v13 = vpack.c.bf16 %v3670_v0, %v3622_v25  ;;  %v850_v18 = vpack.c.bf16 %v803_v1, %v802_v5  ;;  %v3696_v25 = vld [vmem:[#allocation2 + $0xc9] sm:$0xff] }
 0x14e   : > { %v1653_v31 = vsel %vm746_vm1, %v850_v18, %v1142_v43  ;;  %v804_v18 = vld [vmem:[#allocation2 + $0x10] sm:$0xff] }
 0x14f   : > { %1367 = vrot.lane.b32.xlu1 %v1053_v15, %s3220_s17  ;;  %v966_v15 = vld [vmem:[#allocation2 + $0xa2] sm:$0xff]  ;;  %v1725_v35 = vsel %vm1723_vm4, %v1653_v31, %v1214_v42  ;;  %v851_v31 = vpack.c.bf16 %v3500_v40, %v804_v18 }
 0x150   : > { %1509 = vrot.lane.b32.xlu0 %v3614_v4, %s3216_s13  ;;  %v1083_v21 = vpack.c.bf16 %v966_v15, %v3628_v28 }
 0x153   : > { %1439 = vrot.lane.b32.xlu1 %v1080_v22, %s3221_s18  ;;  %v3691_v22 = vpack.c.bf16 %v827_v16, %v3683_v14 }
 0x154   : > { %1513 = vrot.lane.b32.xlu0 %v3620_v23, %s3216_s13 }
 0x157   : > { %1159 = vrot.lane.b32.xlu1 %v931_v26, %s3215_s10 }
 0x158   : > { %1564 = vrot.lane.b32.xlu0 %v931_v26, %s3217_s14  ;;  %v3694_v26 = vld [vmem:[#allocation2 + $0xc1] sm:$0xff] }
 0x159   : > { %v934_v28 = vpack.c.bf16 %v3696_v25, %v3694_v26 }
 0x15b   : > { %1231 = vrot.lane.b32.xlu1 %v1003_v29, %s3214_s9 }
 0x15c   : > { %1615 = vrot.lane.b32.xlu0 %v1003_v29, %s3218_s15  ;;  %v3700_v29 = vld [vmem:[#allocation2 + $0xca] sm:$0xff] }
 0x15f   : > { %1511 = vrot.lane.b32.xlu1 %v3635_v33, %s3216_s13 }
 0x160   : > { %1301 = vrot.lane.b32.xlu0 %v1029_v34, %s3219_s16  ;;  %v1006_v34 = vpack.c.bf16 %v3700_v29, %v3698_v27 }
 0x163   : > { %1562 = vrot.lane.b32.xlu1 %v930_v37, %s3217_s14 }
 0x164   : > { %1560 = vrot.lane.b32.xlu0 %v929_v38, %s3217_s14 }
 0x167   : > { %1155 = vrot.lane.b32.xlu1 %v929_v38, %s3215_s10 }
 0x168   : > { %1611 = vrot.lane.b32.xlu0 %v1001_v41, %s3218_s15 }
 0x16b   : > { %1227 = vrot.lane.b32.xlu1 %v1001_v41, %s3214_s9  ;;  %v1032_v41 = vpack.c.bf16 %v3712_v3, %v827_v16  ;;  %v897_v16 = vld [vmem:[#allocation2 + $0xb9] sm:$0xff] }
 0x16c   : > { %1613 = vrot.lane.b32.xlu0 %v1002_v44, %s3218_s15 }
 0x16d   : > { %v3646_v45 = vpop.permute.xlu1 %1147 }
 0x16e   : > { %v3648_v46 = vpop.permute.xlu0 %1501 }
 0x16f   : > { %1299 = vrot.lane.b32.xlu1 %v1028_v47, %s3219_s16 }
 0x170   : > { %1297 = vrot.lane.b32.xlu0 %v1027_v48, %s3219_s16 }
 0x171   : > { %v3652_v49 = vpop.permute.xlu1 %1219 }
 0x172   : > { %v3654_v50 = vpop.permute.xlu0 %1552 }
 0x173   : > { %1371 = vrot.lane.b32.xlu1 %v1055_v11, %s3220_s17  ;;  %v1004_v11 = vpack.c.bf16 %v967_v56, %v966_v15 }
 0x174   : > { %1369 = vrot.lane.b32.xlu0 %v1054_v51, %s3220_s17  ;;  %v895_v51 = vld [vmem:[#allocation2 + $0xa9] sm:$0xff] }
 0x175   : > { %v3660_v55 = vpop.permute.xlu1 %1215 }
 0x176   : > { %v3658_v53 = vpop.permute.xlu0 %1603 }
 0x177   : > { %1443 = vrot.lane.b32.xlu1 %v1082_v58, %s3221_s18  ;;  %v824_v58 = vld [vmem:[#allocation2 + $0xb0] sm:$0xff] }
 0x178   : > { %1441 = vrot.lane.b32.xlu0 %v1081_v59, %s3221_s18 }
 0x179   : > { %v3666_v62 = vpop.permute.xlu1 %1287 }
 0x17a   : > { %v3664_v61 = vpop.permute.xlu0 %1289 }
 0x17b   : > { %1157 = vrot.lane.b32.xlu1 %v930_v37, %s3215_s10 }
 0x17c   : > { %1229 = vrot.lane.b32.xlu0 %v1002_v44, %s3214_s9 }
 0x17d   : > { %v3674_v7 = vpop.permute.xlu1 %1359 }
 0x17e   : > { %v3676_v8 = vpop.permute.xlu0 %1143 }
 0x17f   : > { %1515 = vrot.lane.b32.xlu1 %v3679_v9, %s3216_s13 }
 0x180   : > { %1373 = vrot.lane.b32.xlu0 %v1056_v13, %s3220_s17  ;;  %v896_v13 = vld [vmem:[#allocation2 + $0xb1] sm:$0xff] }
 0x181   : > { %v3688_v19 = vpop.permute.xlu1 %1431 }
 0x182   : > { %v1286_v60 = vpop.permute.xlu0 %1285 }
 0x183   : > { %1519 = vrot.lane.b32.xlu1 %v3691_v22, %s3216_s13  ;;  %v1774_v36 = vsel %vm1772_vm5, %v1725_v35, %v1286_v60  ;;  %v1030_v60 = vpack.c.bf16 %v824_v58, %v3668_v63 }
 0x184   : > { %1445 = vrot.lane.b32.xlu0 %v1083_v21, %s3221_s18  ;;  %v933_v21 = vpack.c.bf16 %v897_v16, %v896_v13 }
 0x185   : > { %v3706_v2 = vpop.permute.xlu1 %1145 }
 0x186   : > { %v1358_v32 = vpop.permute.xlu0 %1357 }
 0x187   : > { %1570 = vrot.lane.b32.xlu1 %v934_v28, %s3217_s14  ;;  %v1822_v37 = vsel %vm343_vm0, %v1774_v36, %v1358_v32  ;;  %v968_v32 = vld [vmem:[#allocation2 + $0xb2] sm:$0xff]  ;;  %v1057_v36 = vpack.c.bf16 %v896_v13, %v895_v51 }
 0x188   : > { %1621 = vrot.lane.b32.xlu0 %v1006_v34, %s3218_s15 }
 0x189   : > { %v3719_v38 = vpop.permute.xlu1 %1535 }
 0x18a   : > { %v1430_v39 = vpop.permute.xlu0 %1429 }
 0x18b   : > { %v1871_v12 = vsel %vm1869_vm7, %v1822_v37, %v1430_v39  ;;  %1307 = vrot.lane.b32.xlu1 %v1032_v41, %s3219_s16  ;;  %v1084_v41 = vpack.c.bf16 %v968_v32, %v967_v56 }
 0x18c   : > { %v1920_v42 = vsel %vm1918_vm6, %v1871_v12, %v3648_v46  ;;  %1237 = vrot.lane.b32.xlu0 %v1006_v34, %s3214_s9  ;;  %v825_v46 = vld [vmem:[#allocation2 + $0xb8] sm:$0xff] }
 0x18d   : > { %v1969_v43 = vsel %vm1967_vm8, %v1920_v42, %v3654_v50  ;;  %v3729_v44 = vpop.permute.xlu1 %1586  ;;  %v932_v50 = vpack.c.bf16 %v895_v51, %v3670_v0  ;;  %v3737_v5 = vpack.c.bf16 %v825_v46, %v824_v58  ;;  %v969_v0 = vld [vmem:[#allocation2 + $0xba] sm:$0xff]  ;;  %v1058_v51 = vpack.c.bf16 %v3694_v26, %v897_v16 }
 0x18e   : > { %v1218_v47 = vpop.permute.xlu0 %1217  ;;  %v2018_v48 = vsel %vm2016_vm9, %v1969_v43, %v3658_v53  ;;  %v1005_v37 = vpack.c.bf16 %v969_v0, %v968_v32  ;;  %v1031_v43 = vpack.c.bf16 %v3683_v14, %v825_v46 }
 0x18f   : > { %3094 = vmatprep.mubr.msk.bf16.mxu1 %vm2092_vm10, %v2018_v48  ;;  %1165 = vrot.lane.b32.xlu1 %v934_v28, %s3215_s10  ;;  %v1656_v28 = vsel %vm746_vm1, %v851_v31, %v3676_v8  ;;  %v833_v31 = vld [vmem:[#allocation2 + $0xf8] sm:$0xff] }
 0x190   : > { %1617 = vrot.lane.b32.xlu0 %v1004_v11, %s3218_s15  ;;  %v1727_v63 = vsel %vm1723_vm4, %v1656_v28, %v3660_v55 }
 0x191   : > { %v1504_v59 = vpop.permute.xlu1 %1503  ;;  %v1776_v8 = vsel %vm1772_vm5, %v1727_v63, %v3666_v62  ;;  %v1659_v62 = vsel %vm746_vm1, %v852_v20, %v3706_v2  ;;  %v900_v2 = vld [vmem:[#allocation2 + $0xd1] sm:$0xff] }
 0x192   : > { %v1362_v1 = vpop.permute.xlu0 %1361  ;;  %v1824_v12 = vsel %vm343_vm0, %v1776_v8, %v3674_v7  ;;  %v1729_v14 = vsel %vm1723_vm4, %v1659_v62, %v1218_v47  ;;  %v3792_v47 = vld [vmem:[#allocation2 + $0xd8] sm:$0xff]  ;;  %v1059_v18 = vpack.c.bf16 %v900_v2, %v3696_v25 }
 0x193   : > { %1566 = vrot.lane.b32.xlu1 %v932_v50, %s3217_s14  ;;  %v1873_v56 = vsel %vm1869_vm7, %v1824_v12, %v3688_v19  ;;  %v1778_v54 = vsel %vm1772_vm5, %v1729_v14, %v3664_v61  ;;  %v1085_v19 = vpack.c.bf16 %v3698_v27, %v969_v0  ;;  %v3802_v27 = vpack.c.bf16 %v3792_v47, %v3712_v3 }
 0x194   : > { %1517 = vrot.lane.b32.xlu0 %v3737_v5, %s3216_s13  ;;  %v1922_v7 = vsel %vm1918_vm6, %v1873_v56, %v1504_v59  ;;  %v1826_v26 = vsel %vm343_vm0, %v1778_v54, %v1362_v1  ;;  %v1662_v1 = vsel %vm746_vm1, %v3405_v10, %v3646_v45  ;;  %v903_v54 = vld [vmem:[#allocation2 + $0xe9] sm:$0xff] }
 0x195   : > { %v3742_v53 = vpop.permute.xlu1 %1507  ;;  %v1731_v32 = vsel %vm1723_vm4, %v1662_v1, %v3652_v49  ;;  %v975_v1 = vld [vmem:[#allocation2 + $0xea] sm:$0xff] }
 0x196   : > { %v1434_v15 = vpop.permute.xlu0 %1433 }
 0x197   : > { %1303 = vrot.lane.b32.xlu1 %v1030_v60, %s3219_s16  ;;  %v1875_v59 = vsel %vm1869_vm7, %v1826_v26, %v1434_v15  ;;  %v972_v60 = vld [vmem:[#allocation2 + $0xd2] sm:$0xff] }
 0x198   : > { %1568 = vrot.lane.b32.xlu0 %v933_v21, %s3217_s14  ;;  %v1086_v0 = vpack.c.bf16 %v972_v60, %v3700_v29 }
 0x199   : > { %v3750_v34 = vpop.permute.xlu1 %1558 }
 0x19a   : > { %v3752_v35 = vpop.permute.xlu0 %1609 }
 0x19b   : > { %1375 = vrot.lane.b32.xlu1 %v1057_v36, %s3220_s17  ;;  %v3825_v36 = vld [vmem:[#allocation2 + $0xf1] sm:$0xff] }
 0x19c   : > { %1619 = vrot.lane.b32.xlu0 %v1005_v37, %s3218_s15 }
 0x19d   : > { %v3758_v40 = vpop.permute.xlu1 %1295 }
 0x19e   : > { %v3760_v39 = vpop.permute.xlu0 %1225 }
 0x19f   : > { %1447 = vrot.lane.b32.xlu1 %v1084_v41, %s3221_s18 }
 0x1a0   : > { %1233 = vrot.lane.b32.xlu0 %v1004_v11, %s3214_s9 }
 0x1a1   : > { %v3768_v55 = vpop.permute.xlu1 %1153 }
 0x1a2   : > { %v1606_v42 = vpop.permute.xlu0 %1605 }
 0x1a3   : > { %1161 = vrot.lane.b32.xlu1 %v932_v50, %s3215_s10 }
 0x1a4   : > { %1305 = vrot.lane.b32.xlu0 %v1031_v43, %s3219_s16  ;;  %v3841_v43 = vld [vmem:[#allocation2 + $0xf2] sm:$0xff] }
 0x1a5   : > { %v1555_v48 = vpop.permute.xlu1 %1554 }
 0x1a6   : > { %v1506_v11 = vpop.permute.xlu0 %1505  ;;  %v1971_v58 = vsel %vm1967_vm8, %v1922_v7, %v1555_v48  ;;  %v830_v7 = vld [vmem:[#allocation2 + $0xe0] sm:$0xff] }
 0x1a7   : > { %v2020_v46 = vsel %vm2016_vm9, %v1971_v58, %v1606_v42  ;;  %1163 = vrot.lane.b32.xlu1 %v933_v21, %s3215_s10  ;;  %v1924_v50 = vsel %vm1918_vm6, %v1875_v59, %v1506_v11  ;;  %v3808_v21 = vld [vmem:[#allocation2 + $0xf0] sm:$0xff]  ;;  %v3849_v48 = vld [vmem:[#allocation2 + $0x100] sm:$0xff] }
 0x1a8   : > { %1377 = vrot.lane.b32.xlu0 %v1058_v51, %s3220_s17  ;;  %3095 = vmatmul.mubr.msk.bf16.vlgmr.msra.gmra.mrb[8].mxu1 %vm2092_vm10, %v2020_v46  ;;  %v3822_v28 = vpack.c.bf16 %v833_v31, %v3808_v21  ;;  %v1035_v11 = vpack.c.bf16 %v3849_v48, %v833_v31  ;;  %v901_v46 = vld [vmem:[#allocation2 + $0xd9] sm:$0xff] }
 0x1a9   : > { %v1292_v6 = vpop.permute.xlu1 %1291 }
 0x1aa   : > { %v1557_v20 = vpop.permute.xlu0 %1556  ;;  %v1780_v25 = vsel %vm1772_vm5, %v1731_v32, %v1292_v6  ;;  %v902_v6 = vld [vmem:[#allocation2 + $0xe1] sm:$0xff] }
 0x1ab   : > { %1235 = vrot.lane.b32.xlu1 %v1005_v37, %s3214_s9  ;;  %v1973_v13 = vsel %vm1967_vm8, %v1924_v50, %v1557_v20  ;;  %v3827_v37 = vld [vmem:[#allocation2 + $0xf9] sm:$0xff]  ;;  %v935_v20 = vpack.c.bf16 %v901_v46, %v900_v2  ;;  %v936_v59 = vpack.c.bf16 %v903_v54, %v902_v6 }
 0x1ac   : > { %1449 = vrot.lane.b32.xlu0 %v1085_v19, %s3221_s18  ;;  %v937_v42 = vpack.c.bf16 %v3827_v37, %v3825_v36  ;;  %v973_v50 = vld [vmem:[#allocation2 + $0xda] sm:$0xff] }
 0x1ad   : > { %v1364_v61 = vpop.permute.xlu1 %1363 }
 0x1ae   : > { %v1608_v16 = vpop.permute.xlu0 %1607  ;;  %v1828_v10 = vsel %vm343_vm0, %v1780_v25, %v1364_v61 }
 0x1af   : > { %v2022_v15 = vsel %vm2016_vm9, %v1973_v13, %v1608_v16  ;;  %1379 = vrot.lane.b32.xlu1 %v1059_v18, %s3220_s17  ;;  %v1007_v13 = vpack.c.bf16 %v973_v50, %v972_v60  ;;  %v974_v18 = vld [vmem:[#allocation2 + $0xe2] sm:$0xff]  ;;  %v1033_v60 = vpack.c.bf16 %v830_v7, %v3792_v47 }
 0x1b0   : > { %1521 = vrot.lane.b32.xlu0 %v3802_v27, %s3216_s13  ;;  %3098 = vmatprep.mubr.msk.bf16.mxu1 %vm2092_vm10, %v2022_v15  ;;  %v1008_v31 = vpack.c.bf16 %v975_v1, %v974_v18 }
 0x1b1   : > { %v1436_v45 = vpop.permute.xlu1 %1435 }
 0x1b2   : > { %v3818_v3 = vpop.permute.xlu0 %1221  ;;  %v1877_v49 = vsel %vm1869_vm7, %v1828_v10, %v1436_v45 }
 0x1b3   : > { %v1926_v63 = vsel %vm1918_vm6, %v1877_v49, %v3742_v53  ;;  %1451 = vrot.lane.b32.xlu1 %v1086_v0, %s3221_s18  ;;  %v3843_v53 = vld [vmem:[#allocation2 + $0xfa] sm:$0xff]  ;;  %v1061_v49 = vpack.c.bf16 %v3825_v36, %v903_v54 }
 0x1b4   : > { %1525 = vrot.lane.b32.xlu0 %v3822_v28, %s3216_s13  ;;  %v1975_v29 = vsel %vm1967_vm8, %v1926_v63, %v3750_v34  ;;  %v1009_v62 = vpack.c.bf16 %v3843_v53, %v3841_v43 }
 0x1b5   : > { %v1150_v41 = vpop.permute.xlu1 %1149  ;;  %v2024_v12 = vsel %vm2016_vm9, %v1975_v29, %v3752_v35  ;;  %v831_v35 = vld [vmem:[#allocation2 + $0xe8] sm:$0xff] }
 0x1b6   : > { %v1294_v8 = vpop.permute.xlu0 %1293  ;;  %3099 = vmatmul.mubr.msk.bf16.gmra.mrb[12].mxu1 %vm2092_vm10, %v2024_v12  ;;  %v3854_v58 = vpack.c.bf16 %v831_v35, %v830_v7  ;;  %v1034_v32 = vpack.c.bf16 %v3808_v21, %v831_v35  ;;  %v1665_v25 = vsel %vm746_vm1, %v3554_v30, %v1150_v41  ;;  %v1060_v21 = vpack.c.bf16 %v902_v6, %v901_v46 }
 0x1b7   : > { %1171 = vrot.lane.b32.xlu1 %v937_v42, %s3215_s10  ;;  %v1733_v0 = vsel %vm1723_vm4, %v1665_v25, %v3818_v3  ;;  %v1087_v3 = vpack.c.bf16 %v974_v18, %v973_v50  ;;  %v3924_v50 = vld [vmem:[#allocation2 + $0x120] sm:$0xff]  ;;  %v911_v25 = vld [vmem:[#allocation2 + $0x129] sm:$0xff] }
 0x1b8   : > { %1576 = vrot.lane.b32.xlu0 %v937_v42, %s3217_s14  ;;  %v1782_v29 = vsel %vm1772_vm5, %v1733_v0, %v1294_v8  ;;  %v1088_v42 = vpack.c.bf16 %v3841_v43, %v975_v1  ;;  %v983_v0 = vld [vmem:[#allocation2 + $0x12a] sm:$0xff] }
 0x1b9   : > { %v1152_v56 = vpop.permute.xlu1 %1151 }
 0x1ba   : > { %v1366_v34 = vpop.permute.xlu0 %1365  ;;  %v1668_v30 = vsel %vm746_vm1, %v3594_v57, %v1152_v56 }
 0x1bb   : > { %1243 = vrot.lane.b32.xlu1 %v1009_v62, %s3214_s9  ;;  %v1830_v36 = vsel %vm343_vm0, %v1782_v29, %v1366_v34  ;;  %v840_v29 = vld [vmem:[#allocation2 + $0x130] sm:$0xff] }
 0x1bc   : > { %1627 = vrot.lane.b32.xlu0 %v1009_v62, %s3218_s15 }
 0x1bd   : > { %v1224_v51 = vpop.permute.xlu1 %1223 }
 0x1be   : > { %v1438_v14 = vpop.permute.xlu0 %1437  ;;  %v1735_v62 = vsel %vm1723_vm4, %v1668_v30, %v1224_v51 }
 0x1bf   : > { %1523 = vrot.lane.b32.xlu1 %v3854_v58, %s3216_s13  ;;  %v1879_v7 = vsel %vm1869_vm7, %v1830_v36, %v1438_v14  ;;  %v1784_v57 = vsel %vm1772_vm5, %v1735_v62, %v3758_v40  ;;  %v3907_v14 = vld [vmem:[#allocation2 + $0x108] sm:$0xff]  ;;  %v912_v62 = vld [vmem:[#allocation2 + $0x131] sm:$0xff] }
 0x1c0   : > { %1313 = vrot.lane.b32.xlu0 %v1035_v11, %s3219_s16  ;;  %v3903_v11 = vld [vmem:[#allocation2 + $0x101] sm:$0xff] }
 0x1c1   : > { %v1368_v19 = vpop.permute.xlu1 %1367  ;;  %v1062_v54 = vpack.c.bf16 %v3903_v11, %v3827_v37 }
 0x1c2   : > { %v1510_v26 = vpop.permute.xlu0 %1509  ;;  %v1832_v34 = vsel %vm343_vm0, %v1784_v57, %v1368_v19 }
 0x1c3   : > { %1574 = vrot.lane.b32.xlu1 %v936_v59, %s3217_s14  ;;  %v1928_v8 = vsel %vm1918_vm6, %v1879_v7, %v1510_v26  ;;  %v3921_v26 = vpack.c.bf16 %v3907_v14, %v3849_v48 }
 0x1c4   : > { %1572 = vrot.lane.b32.xlu0 %v935_v20, %s3217_s14 }
 0x1c5   : > { %v1440_v61 = vpop.permute.xlu1 %1439 }
 0x1c6   : > { %v3861_v16 = vpop.permute.xlu0 %1513  ;;  %v1881_v46 = vsel %vm1869_vm7, %v1832_v34, %v1440_v61  ;;  %v978_v61 = vld [vmem:[#allocation2 + $0x102] sm:$0xff] }
 0x1c7   : > { %1167 = vrot.lane.b32.xlu1 %v935_v20, %s3215_s10  ;;  %v1089_v48 = vpack.c.bf16 %v978_v61, %v3843_v53 }
 0x1c8   : > { %1623 = vrot.lane.b32.xlu0 %v1007_v13, %s3218_s15 }
 0x1c9   : > { %v3865_v15 = vpop.permute.xlu1 %1159 }
 0x1ca   : > { %v3867_v2 = vpop.permute.xlu0 %1564 }
 0x1cb   : > { %1239 = vrot.lane.b32.xlu1 %v1007_v13, %s3214_s9  ;;  %v839_v13 = vld [vmem:[#allocation2 + $0x128] sm:$0xff] }
 0x1cc   : > { %1625 = vrot.lane.b32.xlu0 %v1008_v31, %s3218_s15  ;;  %v3933_v1 = vpack.c.bf16 %v839_v13, %v3924_v50 }
 0x1cd   : > { %v3875_v10 = vpop.permute.xlu1 %1231 }
 0x1ce   : > { %v3877_v45 = vpop.permute.xlu0 %1615 }
 0x1cf   : > { %1311 = vrot.lane.b32.xlu1 %v1034_v32, %s3219_s16  ;;  %v1671_v32 = vsel %vm746_vm1, %v3566_v52, %v3768_v55  ;;  %v3960_v52 = vld [vmem:[#allocation2 + $0x138] sm:$0xff] }
 0x1d0   : > { %1309 = vrot.lane.b32.xlu0 %v1033_v60, %s3219_s16  ;;  %v3938_v60 = vld [vmem:[#allocation2 + $0x122] sm:$0xff]  ;;  %v1737_v30 = vsel %vm1723_vm4, %v1671_v32, %v3760_v39  ;;  %v3967_v36 = vpack.c.bf16 %v3960_v52, %v840_v29 }
 0x1d1   : > { %v1512_v63 = vpop.permute.xlu1 %1511 }
 0x1d2   : > { %v3884_v47 = vpop.permute.xlu0 %1301  ;;  %v1930_v40 = vsel %vm1918_vm6, %v1881_v46, %v1512_v63 }
 0x1d3   : > { %1383 = vrot.lane.b32.xlu1 %v1061_v49, %s3220_s17 }
 0x1d4   : > { %1381 = vrot.lane.b32.xlu0 %v1060_v21, %s3220_s17  ;;  %v3952_v21 = vpack.c.bf16 %v983_v0, %v3938_v60 }
 0x1d5   : > { %v1563_v41 = vpop.permute.xlu1 %1562 }
 0x1d6   : > { %v1561_v12 = vpop.permute.xlu0 %1560  ;;  %v1979_v6 = vsel %vm1967_vm8, %v1930_v40, %v1563_v41  ;;  %v979_v40 = vld [vmem:[#allocation2 + $0x10a] sm:$0xff] }
 0x1d7   : > { %1455 = vrot.lane.b32.xlu1 %v1088_v42, %s3221_s18  ;;  %v1977_v56 = vsel %vm1967_vm8, %v1928_v8, %v1561_v12  ;;  %v3975_v8 = vld [vmem:[#allocation2 + $0x139] sm:$0xff] }
 0x1d8   : > { %1453 = vrot.lane.b32.xlu0 %v1087_v3, %s3221_s18  ;;  %v1038_v3 = vpack.c.bf16 %v840_v29, %v839_v13  ;;  %v3982_v46 = vpack.c.bf16 %v3975_v8, %v912_v62  ;;  %v837_v13 = vld [vmem:[#allocation2 + $0x118] sm:$0xff] }
 0x1d9   : > { %v3901_v35 = vpop.permute.xlu1 %1155  ;;  %v909_v29 = vld [vmem:[#allocation2 + $0x119] sm:$0xff] }
 0x1da   : > { %v1612_v43 = vpop.permute.xlu0 %1611 }
 0x1db   : > { %v2026_v51 = vsel %vm2016_vm9, %v1977_v56, %v1612_v43  ;;  %1169 = vrot.lane.b32.xlu1 %v936_v59, %s3215_s10 }
 0x1dc   : > { %1241 = vrot.lane.b32.xlu0 %v1008_v31, %s3214_s9  ;;  %3102 = vmatprep.mubr.msk.bf16.mxu1 %vm2092_vm10, %v2026_v51  ;;  %v3936_v31 = vld [vmem:[#allocation2 + $0x121] sm:$0xff]  ;;  %v1065_v51 = vpack.c.bf16 %v912_v62, %v911_v25 }
 0x1dd   : > { %v3917_v20 = vpop.permute.xlu1 %1227  ;;  %v3949_v53 = vpack.c.bf16 %v911_v25, %v3936_v31 }
 0x1de   : > { %v1614_v19 = vpop.permute.xlu0 %1613 }
 0x1df   : > { %v2028_v59 = vsel %vm2016_vm9, %v1979_v6, %v1614_v19  ;;  %1527 = vrot.lane.b32.xlu1 %v3921_v26, %s3216_s13  ;;  %v1010_v19 = vpack.c.bf16 %v979_v40, %v978_v61 }
 0x1e0   : > { %1385 = vrot.lane.b32.xlu0 %v1062_v54, %s3220_s17  ;;  %3103 = vmatmul.mubr.msk.bf16.gmra.mrb[16].mxu1 %vm2092_vm10, %v2028_v59  ;;  %v836_v59 = vld [vmem:[#allocation2 + $0x110] sm:$0xff] }
 0x1e1   : > { %v3930_v37 = vpop.permute.xlu1 %1299  ;;  %v3996_v25 = vpack.c.bf16 %v837_v13, %v836_v59 }
 0x1e2   : > { %v1298_v18 = vpop.permute.xlu0 %1297 }
 0x1e3   : > { %1531 = vrot.lane.b32.xlu1 %v3933_v1, %s3216_s13  ;;  %v1786_v55 = vsel %vm1772_vm5, %v1737_v30, %v1298_v18  ;;  %v1036_v30 = vpack.c.bf16 %v836_v59, %v3907_v14  ;;  %v1674_v14 = vsel %vm746_vm1, %v3614_v4, %v3901_v35 }
 0x1e4   : > { %1457 = vrot.lane.b32.xlu0 %v1089_v48, %s3221_s18 }
 0x1e5   : > { %v3946_v49 = vpop.permute.xlu1 %1371 }
 0x1e6   : > { %v1370_v63 = vpop.permute.xlu0 %1369 }
 0x1e7   : > { %1582 = vrot.lane.b32.xlu1 %v3949_v53, %s3217_s14  ;;  %v1834_v41 = vsel %vm343_vm0, %v1786_v55, %v1370_v63  ;;  %v908_v63 = vld [vmem:[#allocation2 + $0x111] sm:$0xff] }
 0x1e8   : > { %1633 = vrot.lane.b32.xlu0 %v3952_v21, %s3218_s15  ;;  %v939_v55 = vpack.c.bf16 %v909_v29, %v908_v63 }
 0x1e9   : > { %v3964_v12 = vpop.permute.xlu1 %1443 }
 0x1ea   : > { %v1442_v42 = vpop.permute.xlu0 %1441 }
 0x1eb   : > { %v1883_v39 = vsel %vm1869_vm7, %v1834_v41, %v1442_v42  ;;  %1319 = vrot.lane.b32.xlu1 %v1038_v3, %s3219_s16  ;;  %v980_v41 = vld [vmem:[#allocation2 + $0x112] sm:$0xff]  ;;  %v981_v42 = vld [vmem:[#allocation2 + $0x11a] sm:$0xff] }
 0x1ec   : > { %v1932_v7 = vsel %vm1918_vm6, %v1883_v39, %v3861_v16  ;;  %1533 = vrot.lane.b32.xlu0 %v3967_v36, %s3216_s13  ;;  %v3985_v16 = vld [vmem:[#allocation2 + $0x132] sm:$0xff]  ;;  %v1011_v62 = vpack.c.bf16 %v981_v42, %v980_v41 }
 0x1ed   : > { %v1981_v57 = vsel %vm1967_vm8, %v1932_v7, %v3867_v2  ;;  %v1158_v56 = vpop.permute.xlu1 %1157  ;;  %v1092_v6 = vpack.c.bf16 %v3985_v16, %v983_v0  ;;  %v1739_v7 = vsel %vm1723_vm4, %v1674_v14, %v3917_v20  ;;  %v986_v14 = vld [vmem:[#allocation2 + $0x142] sm:$0xff] }
 0x1ee   : > { %v1230_v43 = vpop.permute.xlu0 %1229  ;;  %v2030_v34 = vsel %vm2016_vm9, %v1981_v57, %v3877_v45  ;;  %v907_v45 = vld [vmem:[#allocation2 + $0x109] sm:$0xff]  ;;  %v1677_v57 = vsel %vm746_vm1, %v3635_v33, %v1158_v56 }
 0x1ef   : > { %3106 = vmatprep.mubr.msk.bf16.mxu1 %vm2092_vm10, %v2030_v34  ;;  %1391 = vrot.lane.b32.xlu1 %v1065_v51, %s3220_s17  ;;  %v938_v32 = vpack.c.bf16 %v907_v45, %v3903_v11  ;;  %v1063_v39 = vpack.c.bf16 %v908_v63, %v907_v45  ;;  %v1788_v45 = vsel %vm1772_vm5, %v1739_v7, %v3930_v37 }
 0x1f0   : > { %1584 = vrot.lane.b32.xlu0 %v3982_v46, %s3217_s14  ;;  %v1836_v59 = vsel %vm343_vm0, %v1788_v45, %v3946_v49  ;;  %v1741_v35 = vsel %vm1723_vm4, %v1677_v57, %v1230_v43  ;;  %v844_v45 = vld [vmem:[#allocation2 + $0x150] sm:$0xff] }
 0x1f1   : > { %v1516_v2 = vpop.permute.xlu1 %1515  ;;  %v1885_v4 = vsel %vm1869_vm7, %v1836_v59, %v3964_v12  ;;  %v1790_v49 = vsel %vm1772_vm5, %v1741_v35, %v3884_v47  ;;  %v3201_v59 = vld [vmem:[#allocation2 + $0x140] sm:$0xff]  ;;  %v3202_v35 = vld [vmem:[#allocation2 + $0x148] sm:$0xff] }
 0x1f2   : > { %v1374_v54 = vpop.permute.xlu0 %1373  ;;  %v1934_v33 = vsel %vm1918_vm6, %v1885_v4, %v1516_v2  ;;  %v1064_v2 = vpack.c.bf16 %v3936_v31, %v909_v29  ;;  %v1680_v31 = vsel %vm746_vm1, %v3620_v23, %v3865_v15  ;;  %v1039_v4 = vpack.c.bf16 %v3201_v59, %v3960_v52 }
 0x1f3   : > { %1463 = vrot.lane.b32.xlu1 %v1092_v6, %s3221_s18  ;;  %v1090_v6 = vpack.c.bf16 %v980_v41, %v979_v40  ;;  %v1037_v40 = vpack.c.bf16 %v3924_v50, %v837_v13  ;;  %v1838_v63 = vsel %vm343_vm0, %v1790_v49, %v1374_v54  ;;  %v1091_v41 = vpack.c.bf16 %v3938_v60, %v981_v42  ;;  %v3204_v49 = vld [vmem:[#allocation2 + $0x149] sm:$0xff] }
 0x1f4   : > { %1629 = vrot.lane.b32.xlu0 %v1010_v19, %s3218_s15 }
 0x1f5   : > { %v3993_v18 = vpop.permute.xlu1 %1519 }
 0x1f6   : > { %v1446_v48 = vpop.permute.xlu0 %1445 }
 0x1f7   : > { %1578 = vrot.lane.b32.xlu1 %v938_v32, %s3217_s14  ;;  %v1887_v50 = vsel %vm1869_vm7, %v1838_v63, %v1446_v48  ;;  %v1743_v48 = vsel %vm1723_vm4, %v1680_v31, %v3875_v10  ;;  %v987_v10 = vld [vmem:[#allocation2 + $0x14a] sm:$0xff] }
 0x1f8   : > { %1529 = vrot.lane.b32.xlu0 %v3996_v25, %s3216_s13 }
 0x1f9   : > { %v4001_v61 = vpop.permute.xlu1 %1570 }
 0x1fa   : > { %v4003_v0 = vpop.permute.xlu0 %1621 }
 0x1fb   : > { %1315 = vrot.lane.b32.xlu1 %v1036_v30, %s3219_s16 }
 0x1fc   : > { %1580 = vrot.lane.b32.xlu0 %v939_v55, %s3217_s14 }
 0x1fd   : > { %v4008_v11 = vpop.permute.xlu1 %1307 }
 0x1fe   : > { %v4010_v3 = vpop.permute.xlu0 %1237 }
 0x1ff   : > { %1387 = vrot.lane.b32.xlu1 %v1063_v39, %s3220_s17 }
 0x200   : > { %1631 = vrot.lane.b32.xlu0 %v1011_v62, %s3218_s15 }
 0x201   : > { %v4021_v34 = vpop.permute.xlu1 %1165 }
 0x202   : > { %v1618_v51 = vpop.permute.xlu0 %1617 }
 0x203   : > { %1459 = vrot.lane.b32.xlu1 %v1090_v6, %s3221_s18  ;;  %v4075_v6 = vpack.c.bf16 %v987_v10, %v986_v14 }
 0x204   : > { %1245 = vrot.lane.b32.xlu0 %v1010_v19, %s3214_s9 }
 0x205   : > { %v1567_v20 = vpop.permute.xlu1 %1566 }
 0x206   : > { %v1518_v56 = vpop.permute.xlu0 %1517  ;;  %v1983_v37 = vsel %vm1967_vm8, %v1934_v33, %v1567_v20  ;;  %v1040_v33 = vpack.c.bf16 %v844_v45, %v3202_v35 }
 0x207   : > { %1173 = vrot.lane.b32.xlu1 %v938_v32, %s3215_s10  ;;  %v2032_v19 = vsel %vm2016_vm9, %v1983_v37, %v1618_v51  ;;  %v1936_v47 = vsel %vm1918_vm6, %v1887_v50, %v1518_v56  ;;  %v916_v56 = vld [vmem:[#allocation2 + $0x151] sm:$0xff] }
 0x208   : > { %1317 = vrot.lane.b32.xlu0 %v1037_v40, %s3219_s16  ;;  %3107 = vmatmul.mubr.msk.bf16.gmra.mrb[20].mxu1 %vm2092_vm10, %v2032_v19  ;;  %v3203_v40 = vld [vmem:[#allocation2 + $0x141] sm:$0xff]  ;;  %v1067_v19 = vpack.c.bf16 %v916_v56, %v3204_v49 }
 0x209   : > { %v1304_v12 = vpop.permute.xlu1 %1303  ;;  %v1066_v37 = vpack.c.bf16 %v3203_v40, %v3975_v8 }
 0x20a   : > { %v1569_v43 = vpop.permute.xlu0 %1568  ;;  %v1792_v29 = vsel %vm1772_vm5, %v1743_v48, %v1304_v12  ;;  %v919_v48 = vld [vmem:[#allocation2 + $0x169] sm:$0xff] }
 0x20b   : > { %1175 = vrot.lane.b32.xlu1 %v939_v55, %s3215_s10  ;;  %v1985_v13 = vsel %vm1967_vm8, %v1936_v47, %v1569_v43  ;;  %v985_v55 = vld [vmem:[#allocation2 + $0x13a] sm:$0xff] }
 0x20c   : > { %1389 = vrot.lane.b32.xlu0 %v1064_v2, %s3220_s17  ;;  %v1013_v23 = vpack.c.bf16 %v985_v55, %v3985_v16  ;;  %v1093_v50 = vpack.c.bf16 %v986_v14, %v985_v55  ;;  %v4100_v47 = vld [vmem:[#allocation2 + $0x160] sm:$0xff] }
 0x20d   : > { %v1376_v32 = vpop.permute.xlu1 %1375 }
 0x20e   : > { %v1620_v30 = vpop.permute.xlu0 %1619  ;;  %v1840_v60 = vsel %vm343_vm0, %v1792_v29, %v1376_v32  ;;  %v845_v32 = vld [vmem:[#allocation2 + $0x158] sm:$0xff] }
 0x20f   : > { %v2034_v54 = vsel %vm2016_vm9, %v1985_v13, %v1620_v30  ;;  %1247 = vrot.lane.b32.xlu1 %v1011_v62, %s3214_s9  ;;  %v847_v13 = vld [vmem:[#allocation2 + $0x168] sm:$0xff]  ;;  %v4109_v31 = vpack.c.bf16 %v845_v32, %v844_v45  ;;  %v917_v29 = vld [vmem:[#allocation2 + $0x159] sm:$0xff] }
 0x210   : > { %1461 = vrot.lane.b32.xlu0 %v1091_v41, %s3221_s18  ;;  %3110 = vmatprep.mubr.msk.bf16.mxu1 %vm2092_vm10, %v2034_v54  ;;  %v4107_v41 = vpack.c.bf16 %v847_v13, %v4100_v47  ;;  %v918_v54 = vld [vmem:[#allocation2 + $0x161] sm:$0xff]  ;;  %v943_v14 = vpack.c.bf16 %v917_v29, %v916_v56 }
 0x211   : > { %v1448_v42 = vpop.permute.xlu1 %1447 }
 0x212   : > { %v4060_v39 = vpop.permute.xlu0 %1233  ;;  %v1889_v15 = vsel %vm1869_vm7, %v1840_v60, %v1448_v42 }
 0x213   : > { %v1938_v62 = vsel %vm1918_vm6, %v1889_v15, %v3993_v18  ;;  %1177 = vrot.lane.b32.xlu1 %v3949_v53, %s3215_s10  ;;  %v2498_v18 = vld [vmem:[%s4583_s5] sm:$0x3]  ;;  %v4121_v15 = vpack.c.bf16 %v919_v48, %v918_v54 }
 0x214   : > { %1635 = vrot.lane.b32.xlu0 %v1013_v23, %s3218_s15  ;;  %v1987_v7 = vsel %vm1967_vm8, %v1938_v62, %v4001_v61  ;;  %3179 = vmatprep.subr.msk.bf16.mxu0 %vm2141_vm3, %v2498_v18  ;;  %v2571_v53 = vsel %vm2141_vm3, %v2498_v18, 0  ;;  %v989_v62 = vld [vmem:[#allocation2 + $0x15a] sm:$0xff]  ;;  %v991_v18 = vld [vmem:[#allocation2 + $0x16a] sm:$0xff] }
 0x215   : > { %v1162_v57 = vpop.permute.xlu1 %1161  ;;  %v2036_v16 = vsel %vm2016_vm9, %v1987_v7, %v4003_v0  ;;  %3143 = vmatpush3.bf16.msra.mxu0 %v2571_v53 }
 0x216   : > { %v4071_v51 = vpop.permute.xlu0 %1305  ;;  %3111 = vmatmul.mubr.msk.bf16.gmra.mrb[24].mxu1 %vm2092_vm10, %v2036_v16  ;;  %v1683_v55 = vsel %vm746_vm1, %v3679_v9, %v1162_v57  ;;  %v990_v16 = vld [vmem:[#allocation2 + $0x162] sm:$0xff] }
 0x217   : > { %1179 = vrot.lane.b32.xlu1 %v3982_v46, %s3215_s10  ;;  %v1745_v9 = vsel %vm1723_vm4, %v1683_v55, %v4060_v39  ;;  %v4140_v39 = vpack.c.bf16 %v991_v18, %v990_v16  ;;  %v1068_v55 = vpack.c.bf16 %v918_v54, %v917_v29 }
 0x218   : > { %1637 = vrot.lane.b32.xlu0 %v4075_v6, %s3218_s15  ;;  %v1794_v53 = vsel %vm1772_vm5, %v1745_v9, %v4071_v51  ;;  %v1018_v9 = vld [vmem:[#allocation2 + $0x180] sm:$0xff] }
 0x219   : > { %v1164_v61 = vpop.permute.xlu1 %1163 }
 0x21a   : > { %v4087_v0 = vpop.permute.xlu0 %1377  ;;  %v1686_v45 = vsel %vm746_vm1, %v3737_v5, %v1164_v61 }
 0x21b   : > { %1251 = vrot.lane.b32.xlu1 %v1013_v23, %s3214_s9  ;;  %v1842_v35 = vsel %vm343_vm0, %v1794_v53, %v4087_v0 }
 0x21c   : > { %1249 = vrot.lane.b32.xlu0 %v3952_v21, %s3214_s9  ;;  %v988_v21 = vld [vmem:[#allocation2 + $0x152] sm:$0xff] }
 0x21d   : > { %v1236_v20 = vpop.permute.xlu1 %1235  ;;  %v1094_v63 = vpack.c.bf16 %v988_v21, %v987_v10  ;;  %v1015_v57 = vpack.c.bf16 %v989_v62, %v988_v21  ;;  %v1041_v21 = vpack.c.bf16 %v4100_v47, %v845_v32  ;;  %v1689_v47 = vsel %vm746_vm1, %v3691_v22, %v4021_v34 }
 0x21e   : > { %v1450_v46 = vpop.permute.xlu0 %1449  ;;  %v1749_v54 = vsel %vm1723_vm4, %v1689_v47, %v4010_v3  ;;  %v1074_v47 = vld [vmem:[#allocation2 + $0x192] sm:$0xff] }
 0x21f   : > { %1323 = vrot.lane.b32.xlu1 %v1040_v33, %s3219_s16  ;;  %v1747_v33 = vsel %vm1723_vm4, %v1686_v45, %v1236_v20  ;;  %v1891_v56 = vsel %vm1869_vm7, %v1842_v35, %v1450_v46  ;;  %v848_v46 = vld [vmem:[#allocation2 + $0x170] sm:$0xff] }
 0x220   : > { %1321 = vrot.lane.b32.xlu0 %v1039_v4, %s3219_s16  ;;  %v1796_v5 = vsel %vm1772_vm5, %v1747_v33, %v4008_v11  ;;  %v1046_v45 = vld [vmem:[#allocation2 + $0x189] sm:$0xff] }
 0x221   : > { %v1380_v12 = vpop.permute.xlu1 %1379 }
 0x222   : > { %v1522_v43 = vpop.permute.xlu0 %1521  ;;  %v1844_v0 = vsel %vm343_vm0, %v1796_v5, %v1380_v12  ;;  %v1042_v12 = vpack.c.bf16 %v848_v46, %v847_v13 }
 0x223   : > { %1395 = vrot.lane.b32.xlu1 %v1067_v19, %s3220_s17 }
 0x224   : > { %1393 = vrot.lane.b32.xlu0 %v1066_v37, %s3220_s17 }
 0x225   : > { %v1452_v52 = vpop.permute.xlu1 %1451 }
 0x226   : > { %v4098_v2 = vpop.permute.xlu0 %1525  ;;  %v1893_v37 = vsel %vm1869_vm7, %v1844_v0, %v1452_v52  ;;  %v920_v52 = vld [vmem:[#allocation2 + $0x171] sm:$0xff] }
 0x227   : > { %1467 = vrot.lane.b32.xlu1 %v1094_v63, %s3221_s18 }
 0x228   : > { %1465 = vrot.lane.b32.xlu0 %v1093_v50, %s3221_s18 }
 0x229   : > { %v1172_v8 = vpop.permute.xlu1 %1171 }
 0x22a   : > { %v4104_v30 = vpop.permute.xlu0 %1576  ;;  %v1698_v60 = vsel %vm746_vm1, %v3822_v28, %v1172_v8  ;;  %v1069_v8 = vpack.c.bf16 %v920_v52, %v919_v48 }
 0x22b   : > { %1539 = vrot.lane.b32.xlu1 %v4107_v41, %s3216_s13 }
 0x22c   : > { %1537 = vrot.lane.b32.xlu0 %v4109_v31, %s3216_s13 }
 0x22d   : > { %v1244_v42 = vpop.permute.xlu1 %1243 }
 0x22e   : > { %v4119_v23 = vpop.permute.xlu0 %1627  ;;  %v4124_v10 = vsel %vm1723_vm4, %v1698_v60, %v1244_v42  ;;  %v992_v60 = vld [vmem:[#allocation2 + $0x172] sm:$0xff] }
 0x22f   : > { %1590 = vrot.lane.b32.xlu1 %v4121_v15, %s3217_s14  ;;  %v1096_v42 = vpack.c.bf16 %v992_v60, %v991_v18 }
 0x230   : > { %1588 = vrot.lane.b32.xlu0 %v943_v14, %s3217_s14 }
 0x231   : > { %v1524_v7 = vpop.permute.xlu1 %1523 }
 0x232   : > { %v4131_v28 = vpop.permute.xlu0 %1313  ;;  %v1942_v49 = vsel %vm1918_vm6, %v1893_v37, %v1524_v7  ;;  %v1019_v7 = vld [vmem:[#allocation2 + $0x188] sm:$0xff] }
 0x233   : > { %1181 = vrot.lane.b32.xlu1 %v3541_v24, %s3215_s10  ;;  %v1940_v24 = vsel %vm1918_vm6, %v1891_v56, %v1522_v43  ;;  %v1102_v53 = vpack.c.bf16 %v1019_v7, %v1018_v9 }
 0x234   : > { %1639 = vrot.lane.b32.xlu0 %v1015_v57, %s3218_s15 }
 0x235   : > { %v1575_v59 = vpop.permute.xlu1 %1574 }
 0x236   : > { %v1573_v4 = vpop.permute.xlu0 %1572  ;;  %v1991_v11 = vsel %vm1967_vm8, %v1942_v49, %v1575_v59  ;;  %v921_v59 = vld [vmem:[#allocation2 + $0x179] sm:$0xff] }
 0x237   : > { %1183 = vrot.lane.b32.xlu1 %v943_v14, %s3215_s10  ;;  %v1989_v51 = vsel %vm1967_vm8, %v1940_v24, %v1573_v4  ;;  %v1095_v14 = vpack.c.bf16 %v990_v16, %v989_v62  ;;  %v1045_v16 = vld [vmem:[#allocation2 + $0x181] sm:$0xff]  ;;  %v945_v5 = vpack.c.bf16 %v921_v59, %v920_v52  ;;  %v1047_v52 = vld [vmem:[#allocation2 + $0x191] sm:$0xff] }
 0x238   : > { %1641 = vrot.lane.b32.xlu0 %v4140_v39, %s3218_s15  ;;  %v1108_v24 = vpack.c.bf16 %v1046_v45, %v1045_v16 }
 0x239   : > { %v4153_v61 = vpop.permute.xlu1 %1167 }
 0x23a   : > { %v1624_v40 = vpop.permute.xlu0 %1623 }
 0x23b   : > { %v2038_v20 = vsel %vm2016_vm9, %v1989_v51, %v1624_v40  ;;  %1255 = vrot.lane.b32.xlu1 %v1015_v57, %s3214_s9  ;;  %v849_v57 = vld [vmem:[#allocation2 + $0x178] sm:$0xff] }
 0x23c   : > { %1253 = vrot.lane.b32.xlu0 %v4075_v6, %s3214_s9  ;;  %3114 = vmatprep.mubr.msk.bf16.mxu1 %vm2092_vm10, %v2038_v20  ;;  %v4188_v18 = vpack.c.bf16 %v849_v57, %v848_v46  ;;  %v993_v51 = vld [vmem:[#allocation2 + $0x17a] sm:$0xff]  ;;  %v1072_v20 = vld [vmem:[#allocation2 + $0x182] sm:$0xff] }
 0x23d   : > { %v4164_v19 = vpop.permute.xlu1 %1239  ;;  %v1017_v0 = vpack.c.bf16 %v993_v51, %v992_v60  ;;  %v1070_v60 = vpack.c.bf16 %v1045_v16, %v921_v59 }
 0x23e   : > { %v1626_v43 = vpop.permute.xlu0 %1625 }
 0x23f   : > { %v2040_v63 = vsel %vm2016_vm9, %v1991_v11, %v1626_v43  ;;  %1327 = vrot.lane.b32.xlu1 %v1042_v12, %s3219_s16  ;;  %v1020_v43 = vld [vmem:[#allocation2 + $0x190] sm:$0xff] }
 0x240   : > { %1325 = vrot.lane.b32.xlu0 %v1041_v21, %s3219_s16  ;;  %3115 = vmatmul.mubr.msk.bf16.gmra.mrb[28].mxu1 %vm2092_vm10, %v2040_v63  ;;  %v1044_v21 = vpack.c.bf16 %v1020_v43, %v1019_v7  ;;  %v1043_v63 = vpack.c.bf16 %v1018_v9, %v849_v57 }
 0x241   : > { %v4171_v6 = vpop.permute.xlu1 %1311 }
 0x242   : > { %v1310_v50 = vpop.permute.xlu0 %1309 }
 0x243   : > { %1399 = vrot.lane.b32.xlu1 %v1069_v8, %s3220_s17  ;;  %v1798_v48 = vsel %vm1772_vm5, %v1749_v54, %v1310_v50 }
 0x244   : > { %1397 = vrot.lane.b32.xlu0 %v1068_v55, %s3220_s17  ;;  %v1071_v55 = vpack.c.bf16 %v1047_v52, %v1046_v45 }
 0x245   : > { %v4178_v13 = vpop.permute.xlu1 %1383 }
 0x246   : > { %v1382_v32 = vpop.permute.xlu0 %1381 }
 0x247   : > { %1471 = vrot.lane.b32.xlu1 %v1096_v42, %s3221_s18  ;;  %v1846_v29 = vsel %vm343_vm0, %v1798_v48, %v1382_v32  ;;  %v1100_v32 = vld [vmem:[#allocation2 + $0x1a0] sm:$0xff]  ;;  %v1101_v42 = vld [vmem:[#allocation2 + $0x1a8] sm:$0xff]  ;;  %v1097_v48 = vpack.c.bf16 %v1072_v20, %v993_v51 }
 0x248   : > { %1469 = vrot.lane.b32.xlu0 %v1095_v14, %s3221_s18 }
 0x249   : > { %v4186_v22 = vpop.permute.xlu1 %1455 }
 0x24a   : > { %v1454_v34 = vpop.permute.xlu0 %1453 }
 0x24b   : > { %v1895_v62 = vsel %vm1869_vm7, %v1846_v29, %v1454_v34  ;;  %1543 = vrot.lane.b32.xlu1 %v1102_v53, %s3216_s13  ;;  %v1099_v34 = vld [vmem:[#allocation2 + $0x198] sm:$0xff]  ;;  %v1106_v53 = vld [vmem:[#allocation2 + $0x1a1] sm:$0xff] }
 0x24c   : > { %v1944_v3 = vsel %vm1918_vm6, %v1895_v62, %v4098_v2  ;;  %1541 = vrot.lane.b32.xlu0 %v4188_v18, %s3216_s13  ;;  %v1107_v62 = vld [vmem:[#allocation2 + $0x1a9] sm:$0xff]  ;;  %v1103_v59 = vpack.c.bf16 %v1099_v34, %v1020_v43 }
 0x24d   : > { %v1993_v4 = vsel %vm1967_vm8, %v1944_v3, %v4104_v30  ;;  %v1170_v35 = vpop.permute.xlu1 %1169  ;;  %v1073_v30 = vld [vmem:[#allocation2 + $0x18a] sm:$0xff] }
 0x24e   : > { %v1242_v33 = vpop.permute.xlu0 %1241  ;;  %v2042_v56 = vsel %vm2016_vm9, %v1993_v4, %v4119_v23  ;;  %v1114_v37 = vpack.c.bf16 %v1073_v30, %v1072_v20  ;;  %v1695_v9 = vsel %vm746_vm1, %v3854_v58, %v1170_v35  ;;  %v1098_v54 = vpack.c.bf16 %v1074_v47, %v1073_v30 }
 0x24f   : > { %3118 = vmatprep.mubr.msk.bf16.mxu1 %vm2092_vm10, %v2042_v56  ;;  %1594 = vrot.lane.b32.xlu1 %v1108_v24, %s3217_s14  ;;  %v1110_v35 = vpack.c.bf16 %v1107_v62, %v1106_v53  ;;  %v1113_v56 = vld [vmem:[#allocation2 + $0x1aa] sm:$0xff] }
 0x250   : > { %1592 = vrot.lane.b32.xlu0 %v945_v5, %s3217_s14 }
 0x251   : > { %v1528_v2 = vpop.permute.xlu1 %1527 }
 0x252   : > { %v4203_v40 = vpop.permute.xlu0 %1385 }
 0x253   : > { %1185 = vrot.lane.b32.xlu1 %v4121_v15, %s3215_s10 }
 0x254   : > { %1643 = vrot.lane.b32.xlu0 %v1017_v0, %s3218_s15 }
 0x255   : > { %v4208_v23 = vpop.permute.xlu1 %1531 }
 0x256   : > { %v1458_v46 = vpop.permute.xlu0 %1457 }
 0x257   : > { %1187 = vrot.lane.b32.xlu1 %v945_v5, %s3215_s10 }
 0x258   : > { %1645 = vrot.lane.b32.xlu0 %v1114_v37, %s3218_s15 }
 0x259   : > { %v4212_v49 = vpop.permute.xlu1 %1582 }
 0x25a   : > { %v4214_v11 = vpop.permute.xlu0 %1633 }
 0x25b   : > { %1259 = vrot.lane.b32.xlu1 %v1017_v0, %s3214_s9  ;;  %v1111_v0 = vld [vmem:[#allocation2 + $0x19a] sm:$0xff] }
 0x25c   : > { %1257 = vrot.lane.b32.xlu0 %v4140_v39, %s3214_s9  ;;  %v1692_v39 = vsel %vm746_vm1, %v3802_v27, %v4153_v61  ;;  %v1104_v61 = vpack.c.bf16 %v1101_v42, %v1100_v32 }
 0x25d   : > { %v4219_v15 = vpop.permute.xlu1 %1319  ;;  %v1751_v14 = vsel %vm1723_vm4, %v1692_v39, %v4164_v19  ;;  %v1753_v19 = vsel %vm1723_vm4, %v1695_v9, %v1242_v33  ;;  %v1112_v33 = vld [vmem:[#allocation2 + $0x1a2] sm:$0xff] }
 0x25e   : > { %v4221_v12 = vpop.permute.xlu0 %1533  ;;  %v1800_v29 = vsel %vm1772_vm5, %v1751_v14, %v4171_v6  ;;  %v1802_v4 = vsel %vm1772_vm5, %v1753_v19, %v4131_v28  ;;  %v1116_v20 = vpack.c.bf16 %v1113_v56, %v1112_v33 }
 0x25f   : > { %1331 = vrot.lane.b32.xlu1 %v1044_v21, %s3219_s16  ;;  %v1848_v27 = vsel %vm343_vm0, %v1800_v29, %v4178_v13  ;;  %v1105_v13 = vld [vmem:[#allocation2 + $0x199] sm:$0xff] }
 0x260   : > { %1329 = vrot.lane.b32.xlu0 %v1043_v63, %s3219_s16  ;;  %v1897_v58 = vsel %vm1869_vm7, %v1848_v27, %v4186_v22  ;;  %v1109_v51 = vpack.c.bf16 %v1105_v13, %v1047_v52  ;;  %v1115_v63 = vpack.c.bf16 %v1111_v0, %v1074_v47 }
 0x261   : > { %v4225_v50 = vpop.permute.xlu1 %1391  ;;  %v1946_v16 = vsel %vm1918_vm6, %v1897_v58, %v1528_v2  ;;  %v1850_v2 = vsel %vm343_vm0, %v1802_v4, %v4203_v40 }
 0x262   : > { %v4227_v8 = vpop.permute.xlu0 %1584  ;;  %v1899_v28 = vsel %vm1869_vm7, %v1850_v2, %v1458_v46 }
 0x263   : > { %1403 = vrot.lane.b32.xlu1 %v1071_v55, %s3220_s17 }
 0x264   : > { %1401 = vrot.lane.b32.xlu0 %v1070_v60, %s3220_s17 }
 0x265   : > { %v4238_v7 = vpop.permute.xlu1 %1463 }
 0x266   : > { %v1630_v57 = vpop.permute.xlu0 %1629 }
 0x267   : > { %1475 = vrot.lane.b32.xlu1 %v1098_v54, %s3221_s18 }
 0x268   : > { %1473 = vrot.lane.b32.xlu0 %v1097_v48, %s3221_s18 }
 0x269   : > { %v1579_v45 = vpop.permute.xlu1 %1578 }
 0x26a   : > { %v1530_v6 = vpop.permute.xlu0 %1529  ;;  %v1995_v3 = vsel %vm1967_vm8, %v1946_v16, %v1579_v45 }
 0x26b   : > { %1547 = vrot.lane.b32.xlu1 %v1104_v61, %s3216_s13  ;;  %v2044_v22 = vsel %vm2016_vm9, %v1995_v3, %v1630_v57  ;;  %v1948_v30 = vsel %vm1918_vm6, %v1899_v28, %v1530_v6 }
 0x26c   : > { %1545 = vrot.lane.b32.xlu0 %v1103_v59, %s3216_s13  ;;  %3119 = vmatmul.mubr.msk.bf16.gmra.mrb[32].mxu1 %vm2092_vm10, %v2044_v22 }
 0x26d   : > { %v1316_v24 = vpop.permute.xlu1 %1315 }
 0x26e   : > { %v1581_v5 = vpop.permute.xlu0 %1580  ;;  %v1804_v40 = vsel %vm1772_vm5, %v4124_v10, %v1316_v24  ;;  %v4281_v10 = vld [vmem:[%s4582_s4] ss:$0 sm:$0xff] }
 0x26f   : > { %1598 = vrot.lane.b32.xlu1 %v1110_v35, %s3217_s14  ;;  %v1997_v37 = vsel %vm1967_vm8, %v1948_v30, %v1581_v5 }
 0x270   : > { %1596 = vrot.lane.b32.xlu0 %v1109_v51, %s3217_s14  ;;  %s4436_s14 = scalar_lea.vmem %s4585_s7, %s2991_s28 }
 0x271   : > { %v1388_v43 = vpop.permute.xlu1 %1387 }
 0x272   : > { %v1632_v21 = vpop.permute.xlu0 %1631  ;;  %v1852_v46 = vsel %vm343_vm0, %v1804_v40, %v1388_v43 }
 0x273   : > { %v2046_v52 = vsel %vm2016_vm9, %v1997_v37, %v1632_v21  ;;  %1649 = vrot.lane.b32.xlu1 %v1116_v20, %s3218_s15 }
 0x274   : > { %1647 = vrot.lane.b32.xlu0 %v1115_v63, %s3218_s15  ;;  %3122 = vmatprep.mubr.msk.bf16.mxu1 %vm2092_vm10, %v2046_v52 }
 0x275   : > { %v1460_v55 = vpop.permute.xlu1 %1459 }
 0x276   : > { %v1246_v60 = vpop.permute.xlu0 %1245  ;;  %v1901_v39 = vsel %vm1869_vm7, %v1852_v46, %v1460_v55 }
 0x277   : > { %v1950_v47 = vsel %vm1918_vm6, %v1901_v39, %v4208_v23 }
 0x278   : > { %v1999_v32 = vsel %vm1967_vm8, %v1950_v47, %v4212_v49 }
 0x279   : > { %v1174_v42 = vpop.permute.xlu1 %1173  ;;  %v2048_v9 = vsel %vm2016_vm9, %v1999_v32, %v4214_v11 }
 0x27a   : > { %v1318_v14 = vpop.permute.xlu0 %1317  ;;  %v1701_v57 = vsel %vm746_vm1, %v3921_v26, %v1174_v42  ;;  %3123 = vmatmul.mubr.msk.bf16.gmra.mrb[36].mxu1 %vm2092_vm10, %v2048_v9 }
 0x27b   : > { %v3096_v54 = vpop.f32.mrb[8].mxu1  ;;  %v1757_v23 = vsel %vm1723_vm4, %v1701_v57, %v1246_v60 }
 0x27c   : > { %v2188_v49 = vadd.f32 %v3096_v54, %v4281_v10  ;;  %v2179_v48 = vpop.f32.mrb[9].mxu1  ;;  %v1806_v19 = vsel %vm1772_vm5, %v1757_v23, %v1318_v14 }
 0x27d   : > { %v2180_v29 = vadd.f32 %v4281_v10, %v2179_v48  ;;  %v1176_v34 = vpop.permute.xlu1 %1175  ;;  %v3097_v11 = vpop.f32.mrb[10].mxu1 }
 0x27e   : > { %v2191_v27 = vadd.f32 %v3097_v11, %v4281_v10  ;;  %v1390_v61 = vpop.permute.xlu0 %1389  ;;  %v2182_v58 = vpop.f32.mrb[11].mxu1  ;;  %v2372_v53 = vmax.f32 %v2188_v49, 0.0  ;;  %v1704_v45 = vsel %vm746_vm1, %v3996_v25, %v1176_v34 }
 0x27f   : > { %v2183_v26 = vadd.f32 %v4281_v10, %v2182_v58  ;;  %v2370_v16 = vmax.f32 %v2180_v29, 0.0  ;;  %v1854_v13 = vsel %vm343_vm0, %v1806_v19, %v1390_v61 }
 0x280   : > { %v2373_v62 = vmax.f32 %v2191_v27, 0.0 }
 0x281   : > { %v2371_v6 = vmax.f32 %v2183_v26, 0.0  ;;  %v1248_v59 = vpop.permute.xlu1 %1247 }
 0x282   : > { %v2419_v3 = vpack.c.bf16 %v2373_v62, %v2372_v53  ;;  %v1759_v4 = vsel %vm1723_vm4, %v1704_v45, %v1248_v59  ;;  %v1462_v22 = vpop.permute.xlu0 %1461 }
 0x283   : > { %v2418_v35 = vpack.c.bf16 %v2371_v6, %v2370_v16  ;;  %v1808_v33 = vsel %vm1772_vm5, %v1759_v4, %v4219_v15  ;;  %v1903_v56 = vsel %vm1869_vm7, %v1854_v13, %v1462_v22 }
 0x284   : > { %v1856_v24 = vsel %vm343_vm0, %v1808_v33, %v4225_v50  ;;  %v1952_v25 = vsel %vm1918_vm6, %v1903_v56, %v4221_v12  ;;  %v2468_v9 = vunpack.c.h.b16 %v2419_v3 }
 0x285   : > { %v1178_v5 = vpop.permute.xlu1 %1177  ;;  %3144 = vmatprep.mubr.msk.bf16.mxu0 %vm746_vm1, %v2418_v35  ;;  %v2001_v51 = vsel %vm1967_vm8, %v1952_v25, %v4227_v8  ;;  %v1905_v2 = vsel %vm1869_vm7, %v1856_v24, %v4238_v7 }
 0x286   : > { %v1636_v0 = vpop.permute.xlu0 %1635  ;;  %v1954_v28 = vsel %vm1918_vm6, %v1905_v2, %v3719_v38  ;;  %v1707_v27 = vsel %vm746_vm1, %v3933_v1, %v1178_v5 }
 0x287   : > { %v2050_v15 = vsel %vm2016_vm9, %v2001_v51, %v1636_v0  ;;  %v2003_v12 = vsel %vm1967_vm8, %v1954_v28, %v3729_v44 }
 0x288   : > { %3126 = vmatprep.mubr.msk.bf16.mxu1 %vm2092_vm10, %v2050_v15 }
 0x289   : > { %v1180_v50 = vpop.permute.xlu1 %1179  ;;  %v3100_v20 = vpop.f32.mrb[12].mxu1 }
 0x28a   : > { %v1638_v30 = vpop.permute.xlu0 %1637  ;;  %v2204_v37 = vadd.f32 %v3100_v20, %v4281_v10  ;;  %v2195_v8 = vpop.f32.mrb[13].mxu1  ;;  %v1710_v62 = vsel %vm746_vm1, %v3967_v36, %v1180_v50 }
 0x28b   : > { %v2052_v43 = vsel %vm2016_vm9, %v2003_v12, %v1638_v30  ;;  %v2196_v7 = vadd.f32 %v4281_v10, %v2195_v8  ;;  %v3101_v21 = vpop.f32.mrb[14].mxu1 }
 0x28c   : > { %v2207_v63 = vadd.f32 %v3101_v21, %v4281_v10  ;;  %3127 = vmatmul.mubr.msk.bf16.gmra.mrb[40].mxu1 %vm2092_vm10, %v2052_v43  ;;  %v2198_v38 = vpop.f32.mrb[15].mxu1  ;;  %v2376_v46 = vmax.f32 %v2204_v37, 0.0 }
 0x28d   : > { %v2199_v52 = vadd.f32 %v4281_v10, %v2198_v38  ;;  %v1252_v40 = vpop.permute.xlu1 %1251  ;;  %v2374_v60 = vmax.f32 %v2196_v7, 0.0 }
 0x28e   : > { %v2377_v55 = vmax.f32 %v2207_v63, 0.0  ;;  %v1250_v44 = vpop.permute.xlu0 %1249  ;;  %v1763_v45 = vsel %vm1723_vm4, %v1710_v62, %v1252_v40 }
 0x28f   : > { %v2375_v39 = vmax.f32 %v2199_v52, 0.0  ;;  %v1761_v61 = vsel %vm1723_vm4, %v1707_v27, %v1250_v44 }
 0x290   : > { %v2421_v47 = vpack.c.bf16 %v2377_v55, %v2376_v46 }
 0x291   : > { %v2420_v32 = vpack.c.bf16 %v2375_v39, %v2374_v60  ;;  %v1324_v42 = vpop.permute.xlu1 %1323 }
 0x292   : > { %v1322_v14 = vpop.permute.xlu0 %1321  ;;  %v1812_v1 = vsel %vm1772_vm5, %v1763_v45, %v1324_v42 }
 0x293   : > { %v2469_v57 = vunpack.c.l.b16 %v2420_v32  ;;  %v1810_v19 = vsel %vm1772_vm5, %v1761_v61, %v1322_v14 }
 0x295   : > { %v2507_v54 = vpack.c.b16 %v2469_v57, %v2468_v9  ;;  %v1396_v23 = vpop.permute.xlu1 %1395 }
 0x296   : > { %v1394_v49 = vpop.permute.xlu0 %1393  ;;  %v1860_v4 = vsel %vm343_vm0, %v1812_v1, %v1396_v23 }
 0x297   : > { %3145 = vmatmul.mubr.msk.bf16.vlgmr.msra.gmra.mrb[24].mxu0 %vm746_vm1, %v2507_v54  ;;  %v1858_v53 = vsel %vm343_vm0, %v1810_v19, %v1394_v49 }
 0x298   : > { %3148 = vmatprep.mubr.msk.bf16.mxu0 %vm746_vm1, %v2421_v47 }
 0x299   : > { %v1468_v48 = vpop.permute.xlu1 %1467 }
 0x29a   : > { %v1466_v29 = vpop.permute.xlu0 %1465  ;;  %v1909_v35 = vsel %vm1869_vm7, %v1860_v4, %v1468_v48 }
 0x29b   : > { %v1907_v16 = vsel %vm1869_vm7, %v1858_v53, %v1466_v29 }
 0x29d   : > { %v1540_v34 = vpop.permute.xlu1 %1539 }
 0x29e   : > { %v1538_v11 = vpop.permute.xlu0 %1537  ;;  %v1958_v36 = vsel %vm1918_vm6, %v1909_v35, %v1540_v34 }
 0x29f   : > { %v1956_v6 = vsel %vm1918_vm6, %v1907_v16, %v1538_v11 }
 0x2a1   : > { %v1591_v58 = vpop.permute.xlu1 %1590 }
 0x2a2   : > { %v1589_v26 = vpop.permute.xlu0 %1588  ;;  %v2007_v56 = vsel %vm1967_vm8, %v1958_v36, %v1591_v58 }
 0x2a3   : > { %v2005_v3 = vsel %vm1967_vm8, %v1956_v6, %v1589_v26 }
 0x2a5   : > { %v1182_v59 = vpop.permute.xlu1 %1181 }
 0x2a6   : > { %v1640_v13 = vpop.permute.xlu0 %1639  ;;  %v1713_v14 = vsel %vm746_vm1, %v3527_v17, %v1182_v59 }
 0x2a7   : > { %v2054_v22 = vsel %vm2016_vm9, %v2005_v3, %v1640_v13 }
 0x2a8   : > { %3130 = vmatprep.mubr.msk.bf16.mxu1 %vm2092_vm10, %v2054_v22 }
 0x2a9   : > { %v1184_v33 = vpop.permute.xlu1 %1183 }
 0x2aa   : > { %v1642_v24 = vpop.permute.xlu0 %1641  ;;  %v1716_v48 = vsel %vm746_vm1, %v4109_v31, %v1184_v33 }
 0x2ab   : > { %v2056_v25 = vsel %vm2016_vm9, %v2007_v56, %v1642_v24 }
 0x2ac   : > { %3131 = vmatmul.mubr.msk.bf16.gmra.mrb[44].mxu1 %vm2092_vm10, %v2056_v25 }
 0x2ad   : > { %v1256_v5 = vpop.permute.xlu1 %1255 }
 0x2ae   : > { %v1254_v51 = vpop.permute.xlu0 %1253  ;;  %v1767_v34 = vsel %vm1723_vm4, %v1716_v48, %v1256_v5 }
 0x2af   : > { %v1765_v9 = vsel %vm1723_vm4, %v1713_v14, %v1254_v51 }
 0x2b1   : > { %v1328_v2 = vpop.permute.xlu1 %1327 }
 0x2b2   : > { %v1326_v0 = vpop.permute.xlu0 %1325  ;;  %v1816_v27 = vsel %vm1772_vm5, %v1767_v34, %v1328_v2 }
 0x2b3   : > { %v3104_v15 = vpop.f32.mrb[16].mxu1  ;;  %v1814_v54 = vsel %vm1772_vm5, %v1765_v9, %v1326_v0 }
 0x2b4   : > { %v2220_v28 = vadd.f32 %v3104_v15, %v4281_v10  ;;  %v2211_v50 = vpop.f32.mrb[17].mxu1 }
 0x2b5   : > { %v2212_v20 = vadd.f32 %v4281_v10, %v2211_v50  ;;  %v3105_v12 = vpop.f32.mrb[18].mxu1  ;;  %v1400_v30 = vpop.permute.xlu1 %1399 }
 0x2b6   : > { %v2223_v37 = vadd.f32 %v3105_v12, %v4281_v10  ;;  %v1398_v8 = vpop.permute.xlu0 %1397  ;;  %v2214_v43 = vpop.f32.mrb[19].mxu1  ;;  %v2380_v21 = vmax.f32 %v2220_v28, 0.0  ;;  %v1864_v19 = vsel %vm343_vm0, %v1816_v27, %v1400_v30 }
 0x2b7   : > { %v2215_v7 = vadd.f32 %v4281_v10, %v2214_v43  ;;  %v2378_v38 = vmax.f32 %v2212_v20, 0.0  ;;  %v1862_v49 = vsel %vm343_vm0, %v1814_v54, %v1398_v8 }
 0x2b8   : > { %v2381_v63 = vmax.f32 %v2223_v37, 0.0 }
 0x2b9   : > { %v2379_v52 = vmax.f32 %v2215_v7, 0.0  ;;  %v1472_v40 = vpop.permute.xlu1 %1471 }
 0x2ba   : > { %v2423_v46 = vpack.c.bf16 %v2381_v63, %v2380_v21  ;;  %v1470_v55 = vpop.permute.xlu0 %1469  ;;  %v1913_v53 = vsel %vm1869_vm7, %v1864_v19, %v1472_v40 }
 0x2bb   : > { %v2422_v44 = vpack.c.bf16 %v2379_v52, %v2378_v38  ;;  %v1911_v29 = vsel %vm1869_vm7, %v1862_v49, %v1470_v55 }
 0x2bc   : > { %v2473_v60 = vunpack.c.l.b16 %v2423_v46 }
 0x2bd   : > { %v2472_v39 = vunpack.c.h.b16 %v2422_v44  ;;  %v1544_v47 = vpop.permute.xlu1 %1543 }
 0x2be   : > { %v1542_v32 = vpop.permute.xlu0 %1541  ;;  %v1962_v31 = vsel %vm1918_vm6, %v1913_v53, %v1544_v47 }
 0x2bf   : > { %v2509_v42 = vpack.c.b16 %v2473_v60, %v2472_v39  ;;  %v1960_v11 = vsel %vm1918_vm6, %v1911_v29, %v1542_v32 }
 0x2c1   : > { %3149 = vmatmul.mubr.msk.bf16.gmra.mrb[28].mxu0 %vm746_vm1, %v2509_v42  ;;  %v1595_v57 = vpop.permute.xlu1 %1594 }
 0x2c2   : > { %v1593_v23 = vpop.permute.xlu0 %1592  ;;  %v2011_v16 = vsel %vm1967_vm8, %v1962_v31, %v1595_v57 }
 0x2c3   : > { %v2009_v61 = vsel %vm1967_vm8, %v1960_v11, %v1593_v23 }
 0x2c5   : > { %v1186_v17 = vpop.permute.xlu1 %1185 }
 0x2c6   : > { %v1644_v58 = vpop.permute.xlu0 %1643  ;;  %v1719_v20 = vsel %vm746_vm1, %v4107_v41, %v1186_v17 }
 0x2c7   : > { %v2058_v26 = vsel %vm2016_vm9, %v2009_v61, %v1644_v58 }
 0x2c8   : > { %3134 = vmatprep.mubr.msk.bf16.mxu1 %vm2092_vm10, %v2058_v26 }
 0x2c9   : > { %v1188_v62 = vpop.permute.xlu1 %1187 }
 0x2ca   : > { %v1646_v45 = vpop.permute.xlu0 %1645  ;;  %v1722_v28 = vsel %vm746_vm1, %v4188_v18, %v1188_v62 }
 0x2cb   : > { %v2060_v6 = vsel %vm2016_vm9, %v2011_v16, %v1646_v45 }
 0x2cc   : > { %3135 = vmatmul.mubr.msk.bf16.gmra.mrb[48].mxu1 %vm2092_vm10, %v2060_v6 }
 0x2cd   : > { %v1260_v59 = vpop.permute.xlu1 %1259 }
 0x2ce   : > { %v1258_v1 = vpop.permute.xlu0 %1257  ;;  %v1771_v12 = vsel %vm1723_vm4, %v1722_v28, %v1260_v59 }
 0x2cf   : > { %v1769_v8 = vsel %vm1723_vm4, %v1719_v20, %v1258_v1 }
 0x2d1   : > { %v1332_v3 = vpop.permute.xlu1 %1331 }
 0x2d2   : > { %v1330_v13 = vpop.permute.xlu0 %1329  ;;  %v1820_v43 = vsel %vm1772_vm5, %v1771_v12, %v1332_v3 }
 0x2d3   : > { %v1818_v38 = vsel %vm1772_vm5, %v1769_v8, %v1330_v13 }
 0x2d5   : > { %v1404_v4 = vpop.permute.xlu1 %1403 }
 0x2d6   : > { %v1402_v22 = vpop.permute.xlu0 %1401  ;;  %v1868_v18 = vsel %vm343_vm0, %v1820_v43, %v1404_v4 }
 0x2d7   : > { %v1866_v46 = vsel %vm343_vm0, %v1818_v38, %v1402_v22 }
 0x2d9   : > { %v1476_v35 = vpop.permute.xlu1 %1475 }
 0x2da   : > { %v1474_v36 = vpop.permute.xlu0 %1473  ;;  %v1917_v41 = vsel %vm1869_vm7, %v1868_v18, %v1476_v35 }
 0x2db   : > { %v3108_v33 = vpop.f32.mrb[20].mxu1  ;;  %v1915_v44 = vsel %vm1869_vm7, %v1866_v46, %v1474_v36 }
 0x2dc   : > { %v2236_v56 = vadd.f32 %v3108_v33, %v4281_v10  ;;  %v2227_v24 = vpop.f32.mrb[21].mxu1 }
 0x2dd   : > { %v2228_v25 = vadd.f32 %v4281_v10, %v2227_v24  ;;  %v1548_v5 = vpop.permute.xlu1 %1547  ;;  %v3109_v51 = vpop.f32.mrb[22].mxu1 }
 0x2de   : > { %v1546_v2 = vpop.permute.xlu0 %1545  ;;  %v2239_v0 = vadd.f32 %v3109_v51, %v4281_v10  ;;  %v2230_v15 = vpop.f32.mrb[23].mxu1  ;;  %v2384_v30 = vmax.f32 %v2236_v56, 0.0  ;;  %v1966_v60 = vsel %vm1918_vm6, %v1917_v41, %v1548_v5 }
 0x2df   : > { %v2231_v50 = vadd.f32 %v4281_v10, %v2230_v15  ;;  %v2382_v7 = vmax.f32 %v2228_v25, 0.0  ;;  %v1964_v39 = vsel %vm1918_vm6, %v1915_v44, %v1546_v2 }
 0x2e0   : > { %v2385_v37 = vmax.f32 %v2239_v0, 0.0 }
 0x2e1   : > { %v2383_v21 = vmax.f32 %v2231_v50, 0.0  ;;  %v1599_v63 = vpop.permute.xlu1 %1598 }
 0x2e2   : > { %v2425_v52 = vpack.c.bf16 %v2385_v37, %v2384_v30  ;;  %v1597_v40 = vpop.permute.xlu0 %1596  ;;  %v2015_v47 = vsel %vm1967_vm8, %v1966_v60, %v1599_v63 }
 0x2e3   : > { %v2424_v55 = vpack.c.bf16 %v2383_v21, %v2382_v7  ;;  %v2013_v42 = vsel %vm1967_vm8, %v1964_v39, %v1597_v40 }
 0x2e4   : > { %v2476_v31 = vunpack.c.h.b16 %v2425_v52 }
 0x2e5   : > { %v1650_v32 = vpop.permute.xlu1 %1649  ;;  %3152 = vmatprep.mubr.msk.bf16.mxu0 %vm746_vm1, %v2424_v55 }
 0x2e6   : > { %v2064_v14 = vsel %vm2016_vm9, %v2015_v47, %v1650_v32  ;;  %v1648_v9 = vpop.permute.xlu0 %1647 }
 0x2e7   : > { %v2062_v57 = vsel %vm2016_vm9, %v2013_v42, %v1648_v9 }
 0x2e8   : > { %3138 = vmatprep.mubr.msk.bf16.mxu1 %vm2092_vm10, %v2062_v57 }
 0x2e9   : > { %3139 = vmatmul.mubr.msk.bf16.gmra.mrb[52].mxu1 %vm2092_vm10, %v2064_v14  ;;  %v3112_v54 = vpop.f32.mrb[24].mxu1 }
 0x2ea   : > { %v2252_v23 = vadd.f32 %v3112_v54, %v4281_v10  ;;  %v2243_v49 = vpop.f32.mrb[25].mxu1 }
 0x2eb   : > { %v2244_v48 = vadd.f32 %v4281_v10, %v2243_v49  ;;  %v3113_v29 = vpop.f32.mrb[26].mxu1 }
 0x2ec   : > { %v2255_v34 = vadd.f32 %v3113_v29, %v4281_v10  ;;  %v2246_v11 = vpop.f32.mrb[27].mxu1  ;;  %v2388_v27 = vmax.f32 %v2252_v23, 0.0 }
 0x2ed   : > { %v2247_v17 = vadd.f32 %v4281_v10, %v2246_v11  ;;  %v2386_v58 = vmax.f32 %v2244_v48, 0.0 }
 0x2ee   : > { %v2389_v61 = vmax.f32 %v2255_v34, 0.0 }
 0x2ef   : > { %v2387_v19 = vmax.f32 %v2247_v17, 0.0 }
 0x2f0   : > { %v2427_v26 = vpack.c.bf16 %v2389_v61, %v2388_v27 }
 0x2f1   : > { %v2426_v53 = vpack.c.bf16 %v2387_v19, %v2386_v58 }
 0x2f3   : > { %v2477_v62 = vunpack.c.l.b16 %v2426_v53 }
 0x2f5   : > { %v2511_v16 = vpack.c.b16 %v2477_v62, %v2476_v31 }
 0x2f7   : > { %3153 = vmatmul.mubr.msk.bf16.gmra.mrb[32].mxu0 %vm746_vm1, %v2511_v16 }
 0x2f8   : > { %3156 = vmatprep.mubr.msk.bf16.mxu0 %vm746_vm1, %v2427_v26 }
 0x313   : > { %v3116_v45 = vpop.f32.mrb[28].mxu1 }
 0x314   : > { %v2268_v6 = vadd.f32 %v3116_v45, %v4281_v10  ;;  %v2259_v59 = vpop.f32.mrb[29].mxu1  ;;  %v4421_v45 = vld [vmem:[%s4584_s6] ss:$0 sm:$0xff] }
 0x315   : > { %v2260_v1 = vadd.f32 %v4281_v10, %v2259_v59  ;;  %v3117_v3 = vpop.f32.mrb[30].mxu1 }
 0x316   : > { %v2271_v13 = vadd.f32 %v3117_v3, %v4281_v10  ;;  %v2262_v4 = vpop.f32.mrb[31].mxu1  ;;  %v2392_v35 = vmax.f32 %v2268_v6, 0.0 }
 0x317   : > { %v2263_v22 = vadd.f32 %v4281_v10, %v2262_v4  ;;  %v2390_v33 = vmax.f32 %v2260_v1, 0.0  ;;  %v2736_v1 = vld [vmem:[%s3281_s8 + $0x10] sm:$0xff] }
 0x318   : > { %v2393_v36 = vmax.f32 %v2271_v13, 0.0 }
 0x319   : > { %v2391_v56 = vmax.f32 %v2263_v22, 0.0  ;;  %v2734_v22 = vld [vmem:[%s3281_s8] sm:$0xff] }
 0x31a   : > { %v2429_v24 = vpack.c.bf16 %v2393_v36, %v2392_v35 }
 0x31b   : > { %v2428_v25 = vpack.c.bf16 %v2391_v56, %v2390_v33  ;;  %v2737_v33 = vld [vmem:[%s3281_s8 + $0x18] sm:$0xff] }
 0x31c   : > { %v2481_v5 = vunpack.c.l.b16 %v2429_v24 }
 0x31d   : > { %v2480_v51 = vunpack.c.h.b16 %v2428_v25 }
 0x31f   : > { %v2513_v2 = vpack.c.b16 %v2481_v5, %v2480_v51  ;;  %v2735_v5 = vld [vmem:[%s3281_s8 + $0x8] sm:$0xff] }
 0x321   : > { %3157 = vmatmul.mubr.msk.bf16.gmra.mrb[36].mxu0 %vm746_vm1, %v2513_v2 }
 0x33f   : > { %v3120_v0 = vpop.f32.mrb[32].mxu1 }
 0x340   : > { %v2284_v15 = vadd.f32 %v3120_v0, %v4281_v10  ;;  %v2275_v28 = vpop.f32.mrb[33].mxu1 }
 0x341   : > { %v2276_v50 = vadd.f32 %v4281_v10, %v2275_v28  ;;  %v3121_v20 = vpop.f32.mrb[34].mxu1 }
 0x342   : > { %v2287_v12 = vadd.f32 %v3121_v20, %v4281_v10  ;;  %v2278_v30 = vpop.f32.mrb[35].mxu1  ;;  %v2396_v8 = vmax.f32 %v2284_v15, 0.0 }
 0x343   : > { %v2279_v37 = vadd.f32 %v4281_v10, %v2278_v30  ;;  %v2394_v7 = vmax.f32 %v2276_v50, 0.0 }
 0x344   : > { %v2397_v43 = vmax.f32 %v2287_v12, 0.0 }
 0x345   : > { %v2395_v21 = vmax.f32 %v2279_v37, 0.0 }
 0x346   : > { %v2431_v63 = vpack.c.bf16 %v2397_v43, %v2396_v8 }
 0x347   : > { %v2430_v38 = vpack.c.bf16 %v2395_v21, %v2394_v7 }
 0x348   : > { %v2484_v57 = vunpack.c.h.b16 %v2431_v63 }
 0x349   : > { %3160 = vmatprep.mubr.msk.bf16.mxu0 %vm746_vm1, %v2430_v38 }
 0x34d   : > { %v3124_v18 = vpop.f32.mrb[36].mxu1 }
 0x34e   : > { %v2300_v52 = vadd.f32 %v3124_v18, %v4281_v10  ;;  %v2291_v40 = vpop.f32.mrb[37].mxu1 }
 0x34f   : > { %v2292_v46 = vadd.f32 %v4281_v10, %v2291_v40  ;;  %v3125_v41 = vpop.f32.mrb[38].mxu1 }
 0x350   : > { %v2303_v55 = vadd.f32 %v3125_v41, %v4281_v10  ;;  %v2294_v44 = vpop.f32.mrb[39].mxu1  ;;  %v2400_v39 = vmax.f32 %v2300_v52, 0.0 }
 0x351   : > { %v2295_v60 = vadd.f32 %v4281_v10, %v2294_v44  ;;  %v2398_v32 = vmax.f32 %v2292_v46, 0.0 }
 0x352   : > { %v2401_v47 = vmax.f32 %v2303_v55, 0.0 }
 0x353   : > { %v2399_v42 = vmax.f32 %v2295_v60, 0.0  ;;  %v2740_v60 = vld [vmem:[%s3281_s8 + $0x30] sm:$0xff] }
 0x354   : > { %v2433_v14 = vpack.c.bf16 %v2401_v47, %v2400_v39 }
 0x355   : > { %v2432_v9 = vpack.c.bf16 %v2399_v42, %v2398_v32  ;;  %v2738_v32 = vld [vmem:[%s3281_s8 + $0x20] sm:$0xff] }
 0x357   : > { %v2485_v54 = vunpack.c.l.b16 %v2432_v9  ;;  %v2741_v9 = vld [vmem:[%s3281_s8 + $0x38] sm:$0xff] }
 0x359   : > { %v2515_v23 = vpack.c.b16 %v2485_v54, %v2484_v57 }
 0x35b   : > { %3161 = vmatmul.mubr.msk.bf16.gmra.mrb[40].mxu0 %vm746_vm1, %v2515_v23 }
 0x35c   : > { %3164 = vmatprep.mubr.msk.bf16.mxu0 %vm746_vm1, %v2433_v14 }
 0x35f   : > { %v3128_v49 = vpop.f32.mrb[40].mxu1 }
 0x360   : > { %v2316_v48 = vadd.f32 %v3128_v49, %v4281_v10  ;;  %v2307_v29 = vpop.f32.mrb[41].mxu1  ;;  %v2739_v49 = vld [vmem:[%s3281_s8 + $0x28] sm:$0xff] }
 0x361   : > { %v2308_v34 = vadd.f32 %v4281_v10, %v2307_v29  ;;  %v3129_v11 = vpop.f32.mrb[42].mxu1 }
 0x362   : > { %v2319_v17 = vadd.f32 %v3129_v11, %v4281_v10  ;;  %v2310_v27 = vpop.f32.mrb[43].mxu1  ;;  %v2404_v58 = vmax.f32 %v2316_v48, 0.0 }
 0x363   : > { %v2311_v61 = vadd.f32 %v4281_v10, %v2310_v27  ;;  %v2402_v26 = vmax.f32 %v2308_v34, 0.0 }
 0x364   : > { %v2405_v19 = vmax.f32 %v2319_v17, 0.0 }
 0x365   : > { %v2403_v53 = vmax.f32 %v2311_v61, 0.0 }
 0x366   : > { %v2435_v31 = vpack.c.bf16 %v2405_v19, %v2404_v58 }
 0x367   : > { %v2434_v62 = vpack.c.bf16 %v2403_v53, %v2402_v26 }
 0x368   : > { %v2489_v16 = vunpack.c.l.b16 %v2435_v31 }
 0x369   : > { %v2488_v6 = vunpack.c.h.b16 %v2434_v62 }
 0x36a   : > { %v3146_v59 = vpop.f32.mrb[24].mxu0 }
 0x36b   : > { %v2517_v3 = vpack.c.b16 %v2489_v16, %v2488_v6  ;;  %v2616_v13 = vadd.f32 %v3146_v59, %v4421_v45  ;;  %v2607_v4 = vpop.f32.mrb[25].mxu0 }
 0x36c   : > { %v2608_v35 = vadd.f32 %v4421_v45, %v2607_v4  ;;  %v3147_v36 = vpop.f32.mrb[26].mxu0 }
 0x36d   : > { %v2768_v56 = vadd.f32 %v2736_v1, %v2616_v13  ;;  %v2619_v24 = vadd.f32 %v3147_v36, %v4421_v45  ;;  %3165 = vmatmul.mubr.msk.bf16.gmra.mrb[44].mxu0 %vm746_vm1, %v2517_v3  ;;  %v2610_v25 = vpop.f32.mrb[27].mxu0 }
 0x36e   : > { %v2766_v51 = vadd.f32 %v2734_v22, %v2608_v35  ;;  %v2611_v2 = vadd.f32 %v4421_v45, %v2610_v25 }
 0x36f   : > { %v2800_v0 = vmax.f32 %v2768_v56, 0.0  ;;  %v2769_v15 = vadd.f32 %v2737_v33, %v2619_v24 }
 0x370   : > { %v2798_v28 = vmax.f32 %v2766_v51, 0.0  ;;  %v2767_v50 = vadd.f32 %v2735_v5, %v2611_v2 }
 0x371   : > { %2832 = vst.msk [vmem:[%s4436_s14 + $0x10] sm:$0xff] %vm343_vm0, %v2800_v0  ;;  %v2801_v20 = vmax.f32 %v2769_v15, 0.0 }
 0x372   : > { %2830 = vst.msk [vmem:[%s4436_s14] sm:$0xff] %vm343_vm0, %v2798_v28  ;;  %v2799_v12 = vmax.f32 %v2767_v50, 0.0 }
 0x373   : > { %2833 = vst.msk [vmem:[%s4436_s14 + $0x18] sm:$0xff] %vm343_vm0, %v2801_v20 }
 0x374   : > { %2831 = vst.msk [vmem:[%s4436_s14 + $0x8] sm:$0xff] %vm343_vm0, %v2799_v12 }
 0x37f   : > { %v3132_v30 = vpop.f32.mrb[44].mxu1 }
 0x380   : > { %v2332_v37 = vadd.f32 %v3132_v30, %v4281_v10  ;;  %v2323_v8 = vpop.f32.mrb[45].mxu1 }
 0x381   : > { %v2324_v43 = vadd.f32 %v4281_v10, %v2323_v8  ;;  %v3133_v7 = vpop.f32.mrb[46].mxu1 }
 0x382   : > { %v2335_v21 = vadd.f32 %v3133_v7, %v4281_v10  ;;  %v2326_v63 = vpop.f32.mrb[47].mxu1  ;;  %v2408_v18 = vmax.f32 %v2332_v37, 0.0 }
 0x383   : > { %v2327_v38 = vadd.f32 %v4281_v10, %v2326_v63  ;;  %v2406_v40 = vmax.f32 %v2324_v43, 0.0 }
 0x384   : > { %v2409_v52 = vmax.f32 %v2335_v21, 0.0 }
 0x385   : > { %v2407_v46 = vmax.f32 %v2327_v38, 0.0  ;;  %v2744_v38 = vld [vmem:[%s3281_s8 + $0x50] sm:$0xff] }
 0x386   : > { %v2437_v41 = vpack.c.bf16 %v2409_v52, %v2408_v18 }
 0x387   : > { %v2436_v55 = vpack.c.bf16 %v2407_v46, %v2406_v40 }
 0x388   : > { %v2492_v36 = vunpack.c.h.b16 %v2437_v41  ;;  %v2745_v41 = vld [vmem:[%s3281_s8 + $0x58] sm:$0xff] }
 0x389   : > { %3168 = vmatprep.mubr.msk.bf16.mxu0 %vm746_vm1, %v2436_v55 }
 0x394   : > { %v3150_v44 = vpop.f32.mrb[28].mxu0 }
 0x395   : > { %v2632_v39 = vadd.f32 %v3150_v44, %v4421_v45  ;;  %v2623_v47 = vpop.f32.mrb[29].mxu0 }
 0x396   : > { %v2624_v42 = vadd.f32 %v4421_v45, %v2623_v47  ;;  %v3151_v14 = vpop.f32.mrb[30].mxu0 }
 0x397   : > { %v2772_v57 = vadd.f32 %v2740_v60, %v2632_v39  ;;  %v2635_v54 = vadd.f32 %v3151_v14, %v4421_v45  ;;  %v2626_v23 = vpop.f32.mrb[31].mxu0  ;;  %v2743_v39 = vld [vmem:[%s3281_s8 + $0x48] sm:$0xff] }
 0x398   : > { %v2770_v48 = vadd.f32 %v2738_v32, %v2624_v42  ;;  %v2627_v29 = vadd.f32 %v4421_v45, %v2626_v23 }
 0x399   : > { %v2804_v34 = vmax.f32 %v2772_v57, 0.0  ;;  %v2773_v11 = vadd.f32 %v2741_v9, %v2635_v54 }
 0x39a   : > { %v2802_v17 = vmax.f32 %v2770_v48, 0.0  ;;  %v2771_v27 = vadd.f32 %v2739_v49, %v2627_v29  ;;  %v2748_v48 = vld [vmem:[%s3281_s8 + $0x70] sm:$0xff] }
 0x39b   : > { %2836 = vst.msk [vmem:[%s4436_s14 + $0x30] sm:$0xff] %vm343_vm0, %v2804_v34  ;;  %v2805_v61 = vmax.f32 %v2773_v11, 0.0  ;;  %v2746_v11 = vld [vmem:[%s3281_s8 + $0x60] sm:$0xff] }
 0x39c   : > { %2834 = vst.msk [vmem:[%s4436_s14 + $0x20] sm:$0xff] %vm343_vm0, %v2802_v17  ;;  %v2803_v58 = vmax.f32 %v2771_v27, 0.0 }
 0x39d   : > { %2837 = vst.msk [vmem:[%s4436_s14 + $0x38] sm:$0xff] %vm343_vm0, %v2805_v61  ;;  %v2749_v61 = vld [vmem:[%s3281_s8 + $0x78] sm:$0xff] }
 0x39e   : > { %2835 = vst.msk [vmem:[%s4436_s14 + $0x28] sm:$0xff] %vm343_vm0, %v2803_v58 }
 0x39f   : > { %v3136_v19 = vpop.f32.mrb[48].mxu1 }
 0x3a0   : > { %v2348_v26 = vadd.f32 %v3136_v19, %v4281_v10  ;;  %v2339_v53 = vpop.f32.mrb[49].mxu1 }
 0x3a1   : > { %v2340_v31 = vadd.f32 %v4281_v10, %v2339_v53  ;;  %v3137_v62 = vpop.f32.mrb[50].mxu1  ;;  %v2747_v53 = vld [vmem:[%s3281_s8 + $0x68] sm:$0xff] }
 0x3a2   : > { %v2351_v16 = vadd.f32 %v3137_v62, %v4281_v10  ;;  %v2342_v6 = vpop.f32.mrb[51].mxu1  ;;  %v2412_v1 = vmax.f32 %v2348_v26, 0.0 }
 0x3a3   : > { %v2343_v59 = vadd.f32 %v4281_v10, %v2342_v6  ;;  %v2410_v13 = vmax.f32 %v2340_v31, 0.0 }
 0x3a4   : > { %v2413_v3 = vmax.f32 %v2351_v16, 0.0 }
 0x3a5   : > { %v2411_v4 = vmax.f32 %v2343_v59, 0.0 }
 0x3a6   : > { %v2439_v22 = vpack.c.bf16 %v2413_v3, %v2412_v1 }
 0x3a7   : > { %v2438_v35 = vpack.c.bf16 %v2411_v4, %v2410_v13 }
 0x3a9   : > { %v2493_v33 = vunpack.c.l.b16 %v2438_v35 }
 0x3ab   : > { %v2519_v56 = vpack.c.b16 %v2493_v33, %v2492_v36  ;;  %v2750_v33 = vld [vmem:[%s3281_s8 + $0x80] sm:$0xff] }
 0x3ad   : > { %3169 = vmatmul.mubr.msk.bf16.gmra.mrb[48].mxu0 %vm746_vm1, %v2519_v56 }
 0x3ae   : > { %3172 = vmatprep.mubr.msk.bf16.mxu0 %vm746_vm1, %v2439_v22  ;;  %v2752_v22 = vld [vmem:[%s3281_s8 + $0x90] sm:$0xff] }
 0x3bc   : > { %v3140_v24 = vpop.f32.mrb[52].mxu1 }
 0x3bd   : > { %v2364_v25 = vadd.f32 %v3140_v24, %v4281_v10  ;;  %v2355_v5 = vpop.f32.mrb[53].mxu1 }
 0x3be   : > { %v2356_v51 = vadd.f32 %v4281_v10, %v2355_v5  ;;  %v3141_v2 = vpop.f32.mrb[54].mxu1 }
 0x3bf   : > { %v2367_v0 = vadd.f32 %v3141_v2, %v4281_v10  ;;  %v2358_v15 = vpop.f32.mrb[55].mxu1  ;;  %v2416_v50 = vmax.f32 %v2364_v25, 0.0  ;;  %v2753_v25 = vld [vmem:[%s3281_s8 + $0x98] sm:$0xff] }
 0x3c0   : > { %v2359_v28 = vadd.f32 %v4281_v10, %v2358_v15  ;;  %v2414_v12 = vmax.f32 %v2356_v51, 0.0  ;;  %v2742_v10 = vld [vmem:[%s3281_s8 + $0x40] sm:$0xff] }
 0x3c1   : > { %v2417_v20 = vmax.f32 %v2367_v0, 0.0  ;;  %v2751_v0 = vld [vmem:[%s3281_s8 + $0x88] sm:$0xff] }
 0x3c2   : > { %v2415_v30 = vmax.f32 %v2359_v28, 0.0 }
 0x3c3   : > { %v2441_v37 = vpack.c.bf16 %v2417_v20, %v2416_v50 }
 0x3c4   : > { %v2440_v8 = vpack.c.bf16 %v2415_v30, %v2414_v12 }
 0x3c5   : > { %v2497_v43 = vunpack.c.l.b16 %v2441_v37 }
 0x3c6   : > { %v2496_v7 = vunpack.c.h.b16 %v2440_v8 }
 0x3c8   : > { %v2521_v21 = vpack.c.b16 %v2497_v43, %v2496_v7  ;;  %v2756_v7 = vld [vmem:[%s3281_s8 + $0xb0] sm:$0xff] }
 0x3ca   : > { %3173 = vmatmul.mubr.msk.bf16.gmra.mrb[52].mxu0 %vm746_vm1, %v2521_v21  ;;  %v3154_v63 = vpop.f32.mrb[32].mxu0 }
 0x3cb   : > { %v2648_v18 = vadd.f32 %v3154_v63, %v4421_v45  ;;  %v2639_v52 = vpop.f32.mrb[33].mxu0 }
 0x3cc   : > { %v2640_v40 = vadd.f32 %v4421_v45, %v2639_v52  ;;  %v3155_v46 = vpop.f32.mrb[34].mxu0 }
 0x3cd   : > { %v2776_v55 = vadd.f32 %v2744_v38, %v2648_v18  ;;  %v2651_v44 = vadd.f32 %v3155_v46, %v4421_v45  ;;  %v2642_v60 = vpop.f32.mrb[35].mxu0  ;;  %v2754_v38 = vld [vmem:[%s3281_s8 + $0xa0] sm:$0xff] }
 0x3ce   : > { %v2774_v47 = vadd.f32 %v2742_v10, %v2640_v40  ;;  %v2643_v32 = vadd.f32 %v4421_v45, %v2642_v60  ;;  %v2757_v10 = vld [vmem:[%s3281_s8 + $0xb8] sm:$0xff] }
 0x3cf   : > { %v2808_v42 = vmax.f32 %v2776_v55, 0.0  ;;  %v2777_v14 = vadd.f32 %v2745_v41, %v2651_v44  ;;  %v2755_v55 = vld [vmem:[%s3281_s8 + $0xa8] sm:$0xff] }
 0x3d0   : > { %v2806_v9 = vmax.f32 %v2774_v47, 0.0  ;;  %v2775_v57 = vadd.f32 %v2743_v39, %v2643_v32 }
 0x3d1   : > { %2840 = vst.msk [vmem:[%s4436_s14 + $0x50] sm:$0xff] %vm343_vm0, %v2808_v42  ;;  %v2809_v54 = vmax.f32 %v2777_v14, 0.0 }
 0x3d2   : > { %2838 = vst.msk [vmem:[%s4436_s14 + $0x40] sm:$0xff] %vm343_vm0, %v2806_v9  ;;  %v2807_v23 = vmax.f32 %v2775_v57, 0.0 }
 0x3d3   : > { %2841 = vst.msk [vmem:[%s4436_s14 + $0x58] sm:$0xff] %vm343_vm0, %v2809_v54  ;;  %v2760_v54 = vld [vmem:[%s3281_s8 + $0xd0] sm:$0xff] }
 0x3d4   : > { %2839 = vst.msk [vmem:[%s4436_s14 + $0x48] sm:$0xff] %vm343_vm0, %v2807_v23 }
 0x3f4   : > { %v3158_v49 = vpop.f32.mrb[36].mxu0 }
 0x3f5   : > { %v2664_v29 = vadd.f32 %v3158_v49, %v4421_v45  ;;  %v2655_v34 = vpop.f32.mrb[37].mxu0 }
 0x3f6   : > { %v2656_v17 = vadd.f32 %v4421_v45, %v2655_v34  ;;  %v3159_v27 = vpop.f32.mrb[38].mxu0 }
 0x3f7   : > { %v2780_v58 = vadd.f32 %v2748_v48, %v2664_v29  ;;  %v2667_v19 = vadd.f32 %v3159_v27, %v4421_v45  ;;  %v2658_v26 = vpop.f32.mrb[39].mxu0  ;;  %v2758_v48 = vld [vmem:[%s3281_s8 + $0xc0] sm:$0xff] }
 0x3f8   : > { %v2778_v31 = vadd.f32 %v2746_v11, %v2656_v17  ;;  %v2659_v62 = vadd.f32 %v4421_v45, %v2658_v26  ;;  %v2761_v11 = vld [vmem:[%s3281_s8 + $0xd8] sm:$0xff] }
 0x3f9   : > { %v2812_v16 = vmax.f32 %v2780_v58, 0.0  ;;  %v2781_v6 = vadd.f32 %v2749_v61, %v2667_v19  ;;  %v2759_v58 = vld [vmem:[%s3281_s8 + $0xc8] sm:$0xff] }
 0x3fa   : > { %v2810_v59 = vmax.f32 %v2778_v31, 0.0  ;;  %v2779_v1 = vadd.f32 %v2747_v53, %v2659_v62 }
 0x3fb   : > { %2844 = vst.msk [vmem:[%s4436_s14 + $0x70] sm:$0xff] %vm343_vm0, %v2812_v16  ;;  %v2813_v3 = vmax.f32 %v2781_v6, 0.0 }
 0x3fc   : > { %2842 = vst.msk [vmem:[%s4436_s14 + $0x60] sm:$0xff] %vm343_vm0, %v2810_v59  ;;  %v2811_v13 = vmax.f32 %v2779_v1, 0.0 }
 0x3fd   : > { %2845 = vst.msk [vmem:[%s4436_s14 + $0x78] sm:$0xff] %vm343_vm0, %v2813_v3  ;;  %v2764_v3 = vld [vmem:[%s3281_s8 + $0xf0] sm:$0xff] }
 0x3fe   : > { %2843 = vst.msk [vmem:[%s4436_s14 + $0x68] sm:$0xff] %vm343_vm0, %v2811_v13 }
 0x42e   : > { %v3162_v4 = vpop.f32.mrb[40].mxu0 }
 0x42f   : > { %v2680_v35 = vadd.f32 %v3162_v4, %v4421_v45  ;;  %v2671_v36 = vpop.f32.mrb[41].mxu0 }
 0x430   : > { %v2672_v56 = vadd.f32 %v4421_v45, %v2671_v36  ;;  %v3163_v24 = vpop.f32.mrb[42].mxu0 }
 0x431   : > { %v2784_v5 = vadd.f32 %v2752_v22, %v2680_v35  ;;  %v2683_v51 = vadd.f32 %v3163_v24, %v4421_v45  ;;  %v2674_v2 = vpop.f32.mrb[43].mxu0  ;;  %v2762_v22 = vld [vmem:[%s3281_s8 + $0xe0] sm:$0xff] }
 0x432   : > { %v2782_v15 = vadd.f32 %v2750_v33, %v2672_v56  ;;  %v2675_v28 = vadd.f32 %v4421_v45, %v2674_v2  ;;  %v2765_v33 = vld [vmem:[%s3281_s8 + $0xf8] sm:$0xff] }
 0x433   : > { %v2816_v50 = vmax.f32 %v2784_v5, 0.0  ;;  %v2785_v20 = vadd.f32 %v2753_v25, %v2683_v51  ;;  %v2763_v5 = vld [vmem:[%s3281_s8 + $0xe8] sm:$0xff] }
 0x434   : > { %v2814_v12 = vmax.f32 %v2782_v15, 0.0  ;;  %v2783_v30 = vadd.f32 %v2751_v0, %v2675_v28 }
 0x435   : > { %2848 = vst.msk [vmem:[%s4436_s14 + $0x90] sm:$0xff] %vm343_vm0, %v2816_v50  ;;  %v2817_v37 = vmax.f32 %v2785_v20, 0.0 }
 0x436   : > { %2846 = vst.msk [vmem:[%s4436_s14 + $0x80] sm:$0xff] %vm343_vm0, %v2814_v12  ;;  %v2815_v8 = vmax.f32 %v2783_v30, 0.0 }
 0x437   : > { %2849 = vst.msk [vmem:[%s4436_s14 + $0x98] sm:$0xff] %vm343_vm0, %v2817_v37 }
 0x438   : > { %2847 = vst.msk [vmem:[%s4436_s14 + $0x88] sm:$0xff] %vm343_vm0, %v2815_v8 }
 0x440   : > { %v3166_v43 = vpop.f32.mrb[44].mxu0 }
 0x441   : > { %v2696_v21 = vadd.f32 %v3166_v43, %v4421_v45  ;;  %v2687_v63 = vpop.f32.mrb[45].mxu0 }
 0x442   : > { %v2688_v18 = vadd.f32 %v4421_v45, %v2687_v63  ;;  %v3167_v52 = vpop.f32.mrb[46].mxu0 }
 0x443   : > { %v2788_v40 = vadd.f32 %v2756_v7, %v2696_v21  ;;  %v2699_v46 = vadd.f32 %v3167_v52, %v4421_v45  ;;  %v2690_v41 = vpop.f32.mrb[47].mxu0 }
 0x444   : > { %v2786_v44 = vadd.f32 %v2754_v38, %v2688_v18  ;;  %v2691_v60 = vadd.f32 %v4421_v45, %v2690_v41 }
 0x445   : > { %v2820_v39 = vmax.f32 %v2788_v40, 0.0  ;;  %v2789_v47 = vadd.f32 %v2757_v10, %v2699_v46 }
 0x446   : > { %v2818_v32 = vmax.f32 %v2786_v44, 0.0  ;;  %v2787_v42 = vadd.f32 %v2755_v55, %v2691_v60 }
 0x447   : > { %2852 = vst.msk [vmem:[%s4436_s14 + $0xb0] sm:$0xff] %vm343_vm0, %v2820_v39  ;;  %v2821_v14 = vmax.f32 %v2789_v47, 0.0 }
 0x448   : > { %2850 = vst.msk [vmem:[%s4436_s14 + $0xa0] sm:$0xff] %vm343_vm0, %v2818_v32  ;;  %v2819_v9 = vmax.f32 %v2787_v42, 0.0 }
 0x449   : > { %2853 = vst.msk [vmem:[%s4436_s14 + $0xb8] sm:$0xff] %vm343_vm0, %v2821_v14 }
 0x44a   : > { %2851 = vst.msk [vmem:[%s4436_s14 + $0xa8] sm:$0xff] %vm343_vm0, %v2819_v9 }
 0x480   : > { %v3170_v57 = vpop.f32.mrb[48].mxu0 }
 0x481   : > { %v2712_v23 = vadd.f32 %v3170_v57, %v4421_v45  ;;  %v2703_v49 = vpop.f32.mrb[49].mxu0 }
 0x482   : > { %v2704_v29 = vadd.f32 %v4421_v45, %v2703_v49  ;;  %v3171_v34 = vpop.f32.mrb[50].mxu0 }
 0x483   : > { %v2792_v17 = vadd.f32 %v2760_v54, %v2712_v23  ;;  %v2715_v27 = vadd.f32 %v3171_v34, %v4421_v45  ;;  %v2706_v61 = vpop.f32.mrb[51].mxu0 }
 0x484   : > { %v2790_v19 = vadd.f32 %v2758_v48, %v2704_v29  ;;  %v2707_v26 = vadd.f32 %v4421_v45, %v2706_v61 }
 0x485   : > { %v2824_v53 = vmax.f32 %v2792_v17, 0.0  ;;  %v2793_v31 = vadd.f32 %v2761_v11, %v2715_v27 }
 0x486   : > { %v2822_v62 = vmax.f32 %v2790_v19, 0.0  ;;  %v2791_v16 = vadd.f32 %v2759_v58, %v2707_v26 }
 0x487   : > { %2856 = vst.msk [vmem:[%s4436_s14 + $0xd0] sm:$0xff] %vm343_vm0, %v2824_v53  ;;  %v2825_v6 = vmax.f32 %v2793_v31, 0.0 }
 0x488   : > { %2854 = vst.msk [vmem:[%s4436_s14 + $0xc0] sm:$0xff] %vm343_vm0, %v2822_v62  ;;  %v2823_v59 = vmax.f32 %v2791_v16, 0.0 }
 0x489   : > { %2857 = vst.msk [vmem:[%s4436_s14 + $0xd8] sm:$0xff] %vm343_vm0, %v2825_v6 }
 0x48a   : > { %2855 = vst.msk [vmem:[%s4436_s14 + $0xc8] sm:$0xff] %vm343_vm0, %v2823_v59 }
 0x49d   : > { %v3174_v1 = vpop.f32.mrb[52].mxu0 }
 0x49e   : > { %v2728_v13 = vadd.f32 %v3174_v1, %v4421_v45  ;;  %v2719_v4 = vpop.f32.mrb[53].mxu0 }
 0x49f   : > { %v2720_v35 = vadd.f32 %v4421_v45, %v2719_v4  ;;  %v3175_v36 = vpop.f32.mrb[54].mxu0 }
 0x4a0   : > { %v2796_v56 = vadd.f32 %v2764_v3, %v2728_v13  ;;  %v2731_v24 = vadd.f32 %v3175_v36, %v4421_v45  ;;  %v2722_v25 = vpop.f32.mrb[55].mxu0 }
 0x4a1   : > { %v2794_v51 = vadd.f32 %v2762_v22, %v2720_v35  ;;  %v2723_v2 = vadd.f32 %v4421_v45, %v2722_v25 }
 0x4a2   : > { %v2828_v0 = vmax.f32 %v2796_v56, 0.0  ;;  %v2797_v15 = vadd.f32 %v2765_v33, %v2731_v24 }
 0x4a3   : > { %v2826_v28 = vmax.f32 %v2794_v51, 0.0  ;;  %v2795_v50 = vadd.f32 %v2763_v5, %v2723_v2 }
 0x4a4   : > { %2860 = vst.msk [vmem:[%s4436_s14 + $0xf0] sm:$0xff] %vm343_vm0, %v2828_v0  ;;  %v2829_v20 = vmax.f32 %v2797_v15, 0.0 }
 0x4a5   : > { %2858 = vst.msk [vmem:[%s4436_s14 + $0xe0] sm:$0xff] %vm343_vm0, %v2826_v28  ;;  %v2827_v12 = vmax.f32 %v2795_v50, 0.0 }
 0x4a6   : > { %2861 = vst.msk [vmem:[%s4436_s14 + $0xf8] sm:$0xff] %vm343_vm0, %v2829_v20 }
 0x4a7   : > { %2859 = vst.msk [vmem:[%s4436_s14 + $0xe8] sm:$0xff] %vm343_vm0, %v2827_v12 }
 0x4a8 PF: > { %s17_s24 = sadd.s32 1, %s3211_s24  }
 0x4a9   : > { %p14_p4 = scmp.ge.s32.totalorder %s17_s24, 4  }
 0x4ab   :  { %16 = sbr.rel (!%p14_p4) target bundleno = 1 (0x1), region = 78 }

</bundles_post_ra>
